<compile_context>
chip_gen: v7x
topology: tpu7x:2x2x1
jax: 0.10.0
libtpu: 0.0.40
codegen_flags: <defaults>
</compile_context>

<pallas_src>
import functools
import math

import jax
import jax.numpy as jnp
from jax.experimental import pallas as pl
from jax.experimental.pallas import tpu as pltpu

# ---------------- tiny synthetic DINOv2 config ----------------
B = 2                  # batch
C = 3                  # image channels (DINOv2 takes RGB)
IMG = 16               # image height == width
PATCH = 4              # patch size
NP = (IMG // PATCH) ** 2          # 16 patch tokens
T = NP + 1                        # + [CLS] token
T_PAD = 24                        # per-batch token rows, padded to multiple of 8
ROWS = B * T_PAD                  # token slab rows
H = 32                            # hidden size
NHEADS = 2
HD = H // NHEADS                  # head dim
MLP = 4 * H                       # mlp intermediate
NLAYERS = 2
OUT_DIM = 128                     # wrapper out_dim (lane-dense stand-in for 512)
CPP = C * PATCH * PATCH
EPS = 1e-6                        # HF Dinov2 layer_norm_eps

_STACKED_LAYER_KEYS = ("ln1_g", "ln1_b", "wqkv", "bqkv", "wo", "bo", "ls1",
                       "ln2_g", "ln2_b", "w1", "b1", "w2", "b2", "ls2")


# ---------------- fused Pallas kernel ----------------
def _layer_norm(x, g, b):
    mu = jnp.mean(x, axis=-1, keepdims=True)
    var = jnp.mean((x - mu) ** 2, axis=-1, keepdims=True)
    return (x - mu) * jax.lax.rsqrt(var + EPS) * g + b


def _fused_forward_kernel(
        patches_ref, pw_ref, pb_ref, cls_ref, pos_ref,
        ln1g_ref, ln1b_ref, wqkv_ref, bqkv_ref, wo_ref, bo_ref, ls1_ref,
        ln2g_ref, ln2b_ref, w1_ref, b1_ref, w2_ref, b2_ref, ls2_ref,
        flng_ref, flnb_ref, hw_ref, hb_ref,
        o_ref, x_ref, *, pooled):
    l = pl.program_id(0)

    # ---- Dinov2 embeddings (first grid step only) ----
    # Per-batch block layout (sublane-aligned):
    #   rows 0..NP-1 : patch tokens, row NP : [CLS], rows NP+1..T_PAD-1 : pad.
    @pl.when(l == 0)
    def _embed():
        emb = (jnp.dot(patches_ref[...], pw_ref[...],
                       preferred_element_type=jnp.float32)
               + pb_ref[...])                                   # [B*NP, H]
        for b in range(B):
            blk = jnp.concatenate(
                [emb[b * NP:(b + 1) * NP, :],                   # aligned 16 rows
                 cls_ref[...]], axis=0)                         # [8, H] (CLS+pad)
            x_ref[pl.ds(b * T_PAD, T_PAD), :] = blk + pos_ref[...]

    # ---- one encoder layer per grid step ----
    scale = 1.0 / math.sqrt(HD)
    # mask padded key rows (rows T..T_PAD-1 of each batch block)
    key_mask = jnp.where(
        jax.lax.broadcasted_iota(jnp.int32, (1, T_PAD), 1) < T, 0.0, -1e30)

    xn = _layer_norm(x_ref[...], ln1g_ref[...], ln1b_ref[...])
    qkv = (jnp.dot(xn, wqkv_ref[...], preferred_element_type=jnp.float32)
           + bqkv_ref[...])                                     # [ROWS, 3H]
    for b in range(B):
        rows = qkv[b * T_PAD:(b + 1) * T_PAD, :]                # aligned slice
        ctx_heads = []
        for h in range(NHEADS):
            qh = rows[:, h * HD:(h + 1) * HD]
            kh = rows[:, H + h * HD:H + (h + 1) * HD]
            vh = rows[:, 2 * H + h * HD:2 * H + (h + 1) * HD]
            # QK^T via dot_general on last dims (no explicit transpose)
            s = jax.lax.dot_general(
                qh, kh, (((1,), (1,)), ((), ())),
                preferred_element_type=jnp.float32) * scale     # [T_PAD, T_PAD]
            s = s + key_mask
            s = s - jnp.max(s, axis=-1, keepdims=True)
            p = jnp.exp(s)
            p = p * pl.reciprocal(jnp.sum(p, axis=-1, keepdims=True),
                                  approx=True)
            ctx_heads.append(jnp.dot(p, vh,
                                     preferred_element_type=jnp.float32))
        ctx = jnp.concatenate(ctx_heads, axis=-1)               # lane concat [T_PAD, H]
        attn_b = (jnp.dot(ctx, wo_ref[...],
                          preferred_element_type=jnp.float32) + bo_ref[...])
        # residual + layerscale1, aligned in-place slab update
        x_ref[pl.ds(b * T_PAD, T_PAD), :] = (
            x_ref[pl.ds(b * T_PAD, T_PAD), :] + ls1_ref[...] * attn_b)

    # LayerNorm 2 + MLP on the whole slab
    xn2 = _layer_norm(x_ref[...], ln2g_ref[...], ln2b_ref[...])
    m = jnp.dot(xn2, w1_ref[...], preferred_element_type=jnp.float32) + b1_ref[...]
    # TODO(synk): HF Dinov2 uses exact (erf) GELU; tanh approximation used
    # here for Mosaic-safe lowering (difference is O(1e-3)).
    m = jax.nn.gelu(m, approximate=True)
    m = jnp.dot(m, w2_ref[...], preferred_element_type=jnp.float32) + b2_ref[...]
    x_ref[...] = x_ref[...] + ls2_ref[...] * m                  # layerscale2 + res

    # ---- final LN + wrapper pooling/slicing + wrapper Linear (last step) ----
    @pl.when(l == NLAYERS - 1)
    def _head():
        xn_f = _layer_norm(x_ref[...], flng_ref[...], flnb_ref[...])
        if pooled:
            feats = []
            for b in range(B):
                cls_t = xn_f[b * T_PAD + NP:b * T_PAD + NP + 1, :]     # [1, H]
                avg_t = jnp.mean(xn_f[b * T_PAD:b * T_PAD + NP, :],
                                 axis=0, keepdims=True)                # [1, H]
                feats.append(jnp.concatenate([cls_t, avg_t], axis=-1)) # [1, 2H]
            feat = jnp.concatenate(feats, axis=0)                      # [B, 2H]
        else:
            feat = jnp.concatenate(
                [xn_f[b * T_PAD:b * T_PAD + NP, :] for b in range(B)],
                axis=0)                                                # [B*NP, H]
        o = (jnp.dot(feat, hw_ref[...], preferred_element_type=jnp.float32)
             + hb_ref[...])
        o_ref[...] = o.astype(o_ref.dtype)                     # lane-dense [rows, 128]


# ---------------- pallas_call wrapper ----------------
def _const_map(ndim):
    return lambda l: (0,) * ndim


def _layer_map(ndim):
    return lambda l: (l,) + (0,) * (ndim - 1)


def _cost_estimate(args, out_rows, feat_in):
    flops = 2 * B * NP * CPP * H
    flops += NLAYERS * (2 * ROWS * H * 3 * H                       # qkv
                        + B * NHEADS * 2 * (2 * T_PAD * T_PAD * HD)  # qk + pv
                        + 2 * B * T_PAD * H * H                    # out proj
                        + 2 * 2 * ROWS * H * MLP)                  # mlp
    flops += 2 * out_rows * feat_in * OUT_DIM                      # wrapper head
    transcendentals = NLAYERS * (B * NHEADS * T_PAD * T_PAD + ROWS * MLP)
    bytes_accessed = sum(int(a.size) * a.dtype.itemsize for a in args)
    bytes_accessed += out_rows * OUT_DIM * 4
    return pl.CostEstimate(flops=int(flops),
                           transcendentals=int(transcendentals),
                           bytes_accessed=int(bytes_accessed))


def dinov2_wrapper_forward(x, params, pooled=False):
    patches = extract_patches(x).reshape(B * NP, CPP)      # [B*NP, CPP]
    pw = params["patch_w"].reshape(H, CPP).T               # [CPP, H]

    # reorder / pad embeddings to the aligned block layout
    # (patch tokens rows 0..NP-1, CLS row NP, zeros on pad rows)
    cls_pad = jnp.zeros((T_PAD - NP, H), jnp.float32).at[0].set(params["cls"][0])
    pos_block = jnp.zeros((T_PAD, H), jnp.float32)
    pos_block = pos_block.at[:NP].set(params["pos"][1:])
    pos_block = pos_block.at[NP].set(params["pos"][0])

    stacked = params["stacked_layers"]
    pre_args = [patches, pw, params["patch_b"], cls_pad, pos_block]
    layer_args = [stacked[k] for k in _STACKED_LAYER_KEYS]
    if pooled:
        post_args = [params["final_ln_g"], params["final_ln_b"],
                     params["lin_w_pooled"], params["lin_b_pooled"]]
        out_rows, feat_in = B, 2 * H
    else:
        post_args = [params["final_ln_g"], params["final_ln_b"],
                     params["lin_w"], params["lin_b"]]
        out_rows, feat_in = B * NP, H
    args = pre_args + layer_args + post_args

    in_specs = (
        [pl.BlockSpec(a.shape, _const_map(a.ndim)) for a in pre_args]
        + [pl.BlockSpec((None,) + a.shape[1:], _layer_map(a.ndim))
           for a in layer_args]
        + [pl.BlockSpec(a.shape, _const_map(a.ndim)) for a in post_args])

    kernel = functools.partial(_fused_forward_kernel, pooled=pooled)
    out = pl.pallas_call(
        kernel,
        out_shape=jax.ShapeDtypeStruct((out_rows, OUT_DIM), jnp.float32),
        grid=(NLAYERS,),                                   # one encoder layer / step
        in_specs=in_specs,
        out_specs=pl.BlockSpec((out_rows, OUT_DIM), lambda l: (0, 0)),
        scratch_shapes=[pltpu.VMEM((ROWS, H), jnp.float32)],   # resident token slab
        compiler_params=pltpu.CompilerParams(
            dimension_semantics=("arbitrary",),
            vmem_limit_bytes=32 * 1024 * 1024),
        cost_estimate=_cost_estimate(args, out_rows, feat_in),
    )(*args)
    if pooled:
        return out.reshape(B, 1, OUT_DIM)
    return out.reshape(B, NP, OUT_DIM)


# ---------------- glue (reshapes / parameter setup) ----------------
def extract_patches(x):
    # x: [B, C, IMG, IMG] (NCHW) -> [B, NP, C*P*P], patch features ordered
    # (C, Ph, Pw) to match Conv2d weight flattening.
    g = IMG // PATCH
    x = x.reshape(B, C, g, PATCH, g, PATCH)
    x = x.transpose(0, 2, 4, 1, 3, 5)                      # [B, gh, gw, C, P, P]
    return x.reshape(B, NP, CPP)


def init_params(key):
    def nrm(k, shape, scale=0.02):
        return (scale * jax.random.normal(k, shape)).astype(jnp.float32)

    keys = iter(jax.random.split(key, 256))
    params = {
        "patch_w": nrm(next(keys), (H, C, PATCH, PATCH)),  # Conv2d weight
        "patch_b": nrm(next(keys), (1, H)),
        "cls": nrm(next(keys), (1, H)),
        "pos": nrm(next(keys), (T, H)),
        "final_ln_g": jnp.ones((1, H), jnp.float32),
        "final_ln_b": jnp.zeros((1, H), jnp.float32),
        # wrapper Linear (stored transposed: [in, out])
        "lin_w": nrm(next(keys), (H, OUT_DIM)),
        "lin_b": nrm(next(keys), (1, OUT_DIM)),
        "lin_w_pooled": nrm(next(keys), (2 * H, OUT_DIM)),
        "lin_b_pooled": nrm(next(keys), (1, OUT_DIM)),
    }
    layers = []
    for _ in range(NLAYERS):
        wq, bq = nrm(next(keys), (H, H)), nrm(next(keys), (1, H))
        wk, bk = nrm(next(keys), (H, H)), nrm(next(keys), (1, H))
        wv, bv = nrm(next(keys), (H, H)), nrm(next(keys), (1, H))
        lp = {
            "ln1_g": jnp.ones((1, H), jnp.float32),
            "ln1_b": jnp.zeros((1, H), jnp.float32),
            "wqkv": jnp.concatenate([wq, wk, wv], axis=1),   # fused [H, 3H]
            "bqkv": jnp.concatenate([bq, bk, bv], axis=1),   # fused [1, 3H]
            "wo": nrm(next(keys), (H, H)), "bo": nrm(next(keys), (1, H)),
            "ls1": jnp.full((1, H), 1.0, jnp.float32),       # layerscale_value=1.0
            "ln2_g": jnp.ones((1, H), jnp.float32),
            "ln2_b": jnp.zeros((1, H), jnp.float32),
            "w1": nrm(next(keys), (H, MLP)), "b1": nrm(next(keys), (1, MLP)),
            "w2": nrm(next(keys), (MLP, H)), "b2": nrm(next(keys), (1, H)),
            "ls2": jnp.full((1, H), 1.0, jnp.float32),
        }
        layers.append(lp)
    # stack per-layer params along a leading layer axis (fed per grid step)
    params["stacked_layers"] = {
        k: jnp.stack([lp[k] for lp in layers], axis=0) for k in _STACKED_LAYER_KEYS
    }
    return params


if __name__ == "__main__":
    key = jax.random.PRNGKey(0)
    kx, kp = jax.random.split(key)
    x = jax.random.normal(kx, (B, C, IMG, IMG), dtype=jnp.float32)
    params = init_params(kp)

    out = dinov2_wrapper_forward(x, params, pooled=False)        # [B, NP, OUT_DIM]
    out_pooled = dinov2_wrapper_forward(x, params, pooled=True)  # [B, 1, OUT_DIM]
    jax.block_until_ready((out, out_pooled))

    assert out.shape == (B, NP, OUT_DIM), out.shape
    assert out_pooled.shape == (B, 1, OUT_DIM), out_pooled.shape
    assert jnp.all(jnp.isfinite(out)) and jnp.all(jnp.isfinite(out_pooled))
    print("KERNEL_OK")
</pallas_src>

<mosaic_0001>
module attributes {stable_mosaic.version = 11 : i64} {
  func.func @_fused_forward_kernel(%arg0: i32, %arg1: memref<32x48xf32, #tpu.memory_space<vmem>>, %arg2: memref<48x32xf32, #tpu.memory_space<vmem>>, %arg3: memref<1x32xf32, #tpu.memory_space<vmem>>, %arg4: memref<8x32xf32, #tpu.memory_space<vmem>>, %arg5: memref<24x32xf32, #tpu.memory_space<vmem>>, %arg6: memref<1x1x32xf32, #tpu.memory_space<vmem>>, %arg7: memref<1x1x32xf32, #tpu.memory_space<vmem>>, %arg8: memref<1x32x96xf32, #tpu.memory_space<vmem>>, %arg9: memref<1x1x96xf32, #tpu.memory_space<vmem>>, %arg10: memref<1x32x32xf32, #tpu.memory_space<vmem>>, %arg11: memref<1x1x32xf32, #tpu.memory_space<vmem>>, %arg12: memref<1x1x32xf32, #tpu.memory_space<vmem>>, %arg13: memref<1x1x32xf32, #tpu.memory_space<vmem>>, %arg14: memref<1x1x32xf32, #tpu.memory_space<vmem>>, %arg15: memref<1x32x128xf32, #tpu.memory_space<vmem>>, %arg16: memref<1x1x128xf32, #tpu.memory_space<vmem>>, %arg17: memref<1x128x32xf32, #tpu.memory_space<vmem>>, %arg18: memref<1x1x32xf32, #tpu.memory_space<vmem>>, %arg19: memref<1x1x32xf32, #tpu.memory_space<vmem>>, %arg20: memref<1x32xf32, #tpu.memory_space<vmem>>, %arg21: memref<1x32xf32, #tpu.memory_space<vmem>>, %arg22: memref<32x128xf32, #tpu.memory_space<vmem>>, %arg23: memref<1x128xf32, #tpu.memory_space<vmem>>, %arg24: memref<32x128xf32, #tpu.memory_space<vmem>>, %arg25: memref<48x32xf32, #tpu.memory_space<vmem>>) attributes {dimension_semantics = [#tpu.dimension_semantics<arbitrary>], iteration_bounds = array<i64: 2>, scalar_prefetch = 0 : i64, scratch_operands = 1 : i64, tpu.core_type = #tpu.core_type<tc>, window_params = [{pipeline_mode = #tpu.pipeline_mode<synchronous>, transform_indices = @transform_0, window_bounds = array<i64: 32, 48>}, {pipeline_mode = #tpu.pipeline_mode<synchronous>, transform_indices = @transform_1, window_bounds = array<i64: 48, 32>}, {pipeline_mode = #tpu.pipeline_mode<synchronous>, transform_indices = @transform_2, window_bounds = array<i64: 1, 32>}, {pipeline_mode = #tpu.pipeline_mode<synchronous>, transform_indices = @transform_3, window_bounds = array<i64: 8, 32>}, {pipeline_mode = #tpu.pipeline_mode<synchronous>, transform_indices = @transform_4, window_bounds = array<i64: 24, 32>}, {transform_indices = @transform_5, window_bounds = array<i64: 1, 1, 32>}, {transform_indices = @transform_6, window_bounds = array<i64: 1, 1, 32>}, {transform_indices = @transform_7, window_bounds = array<i64: 1, 32, 96>}, {transform_indices = @transform_8, window_bounds = array<i64: 1, 1, 96>}, {transform_indices = @transform_9, window_bounds = array<i64: 1, 32, 32>}, {transform_indices = @transform_10, window_bounds = array<i64: 1, 1, 32>}, {transform_indices = @transform_11, window_bounds = array<i64: 1, 1, 32>}, {transform_indices = @transform_12, window_bounds = array<i64: 1, 1, 32>}, {transform_indices = @transform_13, window_bounds = array<i64: 1, 1, 32>}, {transform_indices = @transform_14, window_bounds = array<i64: 1, 32, 128>}, {transform_indices = @transform_15, window_bounds = array<i64: 1, 1, 128>}, {transform_indices = @transform_16, window_bounds = array<i64: 1, 128, 32>}, {transform_indices = @transform_17, window_bounds = array<i64: 1, 1, 32>}, {transform_indices = @transform_18, window_bounds = array<i64: 1, 1, 32>}, {pipeline_mode = #tpu.pipeline_mode<synchronous>, transform_indices = @transform_19, window_bounds = array<i64: 1, 32>}, {pipeline_mode = #tpu.pipeline_mode<synchronous>, transform_indices = @transform_20, window_bounds = array<i64: 1, 32>}, {pipeline_mode = #tpu.pipeline_mode<synchronous>, transform_indices = @transform_21, window_bounds = array<i64: 32, 128>}, {pipeline_mode = #tpu.pipeline_mode<synchronous>, transform_indices = @transform_22, window_bounds = array<i64: 1, 128>}, {pipeline_mode = #tpu.pipeline_mode<synchronous>, transform_indices = @transform_23, window_bounds = array<i64: 32, 128>}]} {
    %c0_i32 = arith.constant 0 : i32
    %0 = arith.cmpi eq, %arg0, %c0_i32 : i32
    %1 = arith.extui %0 : i1 to i32
    %c0_i32_0 = arith.constant 0 : i32
    %2 = arith.cmpi ne, %1, %c0_i32_0 : i32
    scf.if %2 {
      %c0_107 = arith.constant 0 : index
      %c0_108 = arith.constant 0 : index
      %215 = vector.load %arg1[%c0_107, %c0_108] : memref<32x48xf32, #tpu.memory_space<vmem>>, vector<32x48xf32>
      %c0_109 = arith.constant 0 : index
      %c0_110 = arith.constant 0 : index
      %216 = vector.load %arg2[%c0_109, %c0_110] : memref<48x32xf32, #tpu.memory_space<vmem>>, vector<48x32xf32>
      %cst_111 = arith.constant dense<0.000000e+00> : vector<32x32xf32>
      %217 = tpu.matmul %215, %216, %cst_111 {dimension_numbers = #tpu.dot_dimension_numbers<[1], [0], [0], [1], [0, 0, 1, 1], [], []>} : vector<32x48xf32>, vector<48x32xf32>, vector<32x32xf32> -> vector<32x32xf32>
      %c0_112 = arith.constant 0 : index
      %c0_113 = arith.constant 0 : index
      %218 = vector.load %arg3[%c0_112, %c0_113] : memref<1x32xf32, #tpu.memory_space<vmem>>, vector<1x32xf32>
      %219 = vector.broadcast %218 : vector<1x32xf32> to vector<32x32xf32>
      %220 = arith.addf %217, %219 : vector<32x32xf32>
      %221 = vector.extract_strided_slice %220 {offsets = [0, 0], sizes = [16, 32], strides = [1, 1]} : vector<32x32xf32> to vector<16x32xf32>
      %c0_114 = arith.constant 0 : index
      %c0_115 = arith.constant 0 : index
      %222 = vector.load %arg4[%c0_114, %c0_115] : memref<8x32xf32, #tpu.memory_space<vmem>>, vector<8x32xf32>
      %223 = tpu.concatenate %221, %222 in 0 : vector<16x32xf32>, vector<8x32xf32> -> vector<24x32xf32>
      %c0_116 = arith.constant 0 : index
      %c0_117 = arith.constant 0 : index
      %224 = vector.load %arg5[%c0_116, %c0_117] : memref<24x32xf32, #tpu.memory_space<vmem>>, vector<24x32xf32>
      %225 = arith.addf %223, %224 : vector<24x32xf32>
      %c0_118 = arith.constant 0 : index
      %c0_119 = arith.constant 0 : index
      %226 = vector.load %arg25[%c0_118, %c0_119] : memref<48x32xf32, #tpu.memory_space<vmem>>, vector<24x32xf32>
      tpu.vector_store %arg25[%c0_118, %c0_119], %225 {strides = array<i32>} : memref<48x32xf32, #tpu.memory_space<vmem>>, vector<24x32xf32>,
      %227 = vector.extract_strided_slice %220 {offsets = [16, 0], sizes = [16, 32], strides = [1, 1]} : vector<32x32xf32> to vector<16x32xf32>
      %c0_120 = arith.constant 0 : index
      %c0_121 = arith.constant 0 : index
      %228 = vector.load %arg4[%c0_120, %c0_121] : memref<8x32xf32, #tpu.memory_space<vmem>>, vector<8x32xf32>
      %229 = tpu.concatenate %227, %228 in 0 : vector<16x32xf32>, vector<8x32xf32> -> vector<24x32xf32>
      %c0_122 = arith.constant 0 : index
      %c0_123 = arith.constant 0 : index
      %230 = vector.load %arg5[%c0_122, %c0_123] : memref<24x32xf32, #tpu.memory_space<vmem>>, vector<24x32xf32>
      %231 = arith.addf %229, %230 : vector<24x32xf32>
      %c24_124 = arith.constant 24 : index
      %c0_125 = arith.constant 0 : index
      %232 = vector.load %arg25[%c24_124, %c0_125] : memref<48x32xf32, #tpu.memory_space<vmem>>, vector<24x32xf32>
      tpu.vector_store %arg25[%c24_124, %c0_125], %231 {strides = array<i32>} : memref<48x32xf32, #tpu.memory_space<vmem>>, vector<24x32xf32>,
    } else {
    }
    %3 = tpu.iota {dimensions = array<i32: 1>} : vector<1x24xi32>
    %c17_i32 = arith.constant 17 : i32
    %4 = vector.broadcast %c17_i32 : i32 to vector<1x24xi32>
    %5 = arith.cmpi slt, %3, %4 : vector<1x24xi32>
    %cst = arith.constant 0.000000e+00 : f32
    %cst_1 = arith.constant -1.000000e+30 : f32
    %6 = vector.broadcast %cst : f32 to vector<1x24xf32>
    %7 = vector.broadcast %cst_1 : f32 to vector<1x24xf32>
    %8 = arith.select %5, %6, %7 : vector<1x24xi1>, vector<1x24xf32>
    %c0 = arith.constant 0 : index
    %c0_2 = arith.constant 0 : index
    %9 = vector.load %arg25[%c0, %c0_2] : memref<48x32xf32, #tpu.memory_space<vmem>>, vector<48x32xf32>
    %c0_3 = arith.constant 0 : index
    %c0_4 = arith.constant 0 : index
    %c0_5 = arith.constant 0 : index
    %10 = vector.load %arg6[%c0_3, %c0_4, %c0_5] : memref<1x1x32xf32, #tpu.memory_space<vmem>>, vector<1x1x32xf32>
    %11 = vector.shape_cast %10 : vector<1x1x32xf32> to vector<1x32xf32>
    %c0_6 = arith.constant 0 : index
    %c0_7 = arith.constant 0 : index
    %c0_8 = arith.constant 0 : index
    %12 = vector.load %arg7[%c0_6, %c0_7, %c0_8] : memref<1x1x32xf32, #tpu.memory_space<vmem>>, vector<1x1x32xf32>
    %13 = vector.shape_cast %12 : vector<1x1x32xf32> to vector<1x32xf32>
    %cst_9 = arith.constant dense<0.000000e+00> : vector<48xf32>
    %14 = vector.multi_reduction <add>, %9, %cst_9 [1] : vector<48x32xf32> to vector<48xf32>
    %15 = vector.shape_cast %14 : vector<48xf32> to vector<48x1xf32>
    %cst_10 = arith.constant 3.200000e+01 : f32
    %16 = vector.broadcast %cst_10 : f32 to vector<48x1xf32>
    %17 = arith.divf %15, %16 : vector<48x1xf32>
    %18 = vector.broadcast %17 : vector<48x1xf32> to vector<48x32xf32>
    %19 = arith.subf %9, %18 : vector<48x32xf32>
    %20 = arith.mulf %19, %19 : vector<48x32xf32>
    %cst_11 = arith.constant dense<0.000000e+00> : vector<48xf32>
    %21 = vector.multi_reduction <add>, %20, %cst_11 [1] : vector<48x32xf32> to vector<48xf32>
    %22 = vector.shape_cast %21 : vector<48xf32> to vector<48x1xf32>
    %cst_12 = arith.constant 3.200000e+01 : f32
    %23 = vector.broadcast %cst_12 : f32 to vector<48x1xf32>
    %24 = arith.divf %22, %23 : vector<48x1xf32>
    %25 = vector.broadcast %17 : vector<48x1xf32> to vector<48x32xf32>
    %26 = arith.subf %9, %25 : vector<48x32xf32>
    %cst_13 = arith.constant 9.99999997E-7 : f32
    %27 = vector.broadcast %cst_13 : f32 to vector<48x1xf32>
    %28 = arith.addf %24, %27 : vector<48x1xf32>
    %29 = math.rsqrt %28 : vector<48x1xf32>
    %30 = vector.broadcast %29 : vector<48x1xf32> to vector<48x32xf32>
    %31 = arith.mulf %26, %30 : vector<48x32xf32>
    %32 = vector.broadcast %11 : vector<1x32xf32> to vector<48x32xf32>
    %33 = arith.mulf %31, %32 : vector<48x32xf32>
    %34 = vector.broadcast %13 : vector<1x32xf32> to vector<48x32xf32>
    %35 = arith.addf %33, %34 : vector<48x32xf32>
    %c0_14 = arith.constant 0 : index
    %c0_15 = arith.constant 0 : index
    %c0_16 = arith.constant 0 : index
    %36 = vector.load %arg8[%c0_14, %c0_15, %c0_16] : memref<1x32x96xf32, #tpu.memory_space<vmem>>, vector<1x32x96xf32>
    %37 = vector.shape_cast %36 : vector<1x32x96xf32> to vector<32x96xf32>
    %cst_17 = arith.constant dense<0.000000e+00> : vector<48x96xf32>
    %38 = tpu.matmul %35, %37, %cst_17 {dimension_numbers = #tpu.dot_dimension_numbers<[1], [0], [0], [1], [0, 0, 1, 1], [], []>} : vector<48x32xf32>, vector<32x96xf32>, vector<48x96xf32> -> vector<48x96xf32>
    %c0_18 = arith.constant 0 : index
    %c0_19 = arith.constant 0 : index
    %c0_20 = arith.constant 0 : index
    %39 = vector.load %arg9[%c0_18, %c0_19, %c0_20] : memref<1x1x96xf32, #tpu.memory_space<vmem>>, vector<1x1x96xf32>
    %40 = vector.shape_cast %39 : vector<1x1x96xf32> to vector<1x96xf32>
    %41 = vector.broadcast %40 : vector<1x96xf32> to vector<48x96xf32>
    %42 = arith.addf %38, %41 : vector<48x96xf32>
    %43 = vector.extract_strided_slice %42 {offsets = [0, 0], sizes = [24, 96], strides = [1, 1]} : vector<48x96xf32> to vector<24x96xf32>
    %44 = vector.extract_strided_slice %43 {offsets = [0, 0], sizes = [24, 16], strides = [1, 1]} : vector<24x96xf32> to vector<24x16xf32>
    %45 = vector.extract_strided_slice %43 {offsets = [0, 32], sizes = [24, 16], strides = [1, 1]} : vector<24x96xf32> to vector<24x16xf32>
    %46 = vector.extract_strided_slice %43 {offsets = [0, 64], sizes = [24, 16], strides = [1, 1]} : vector<24x96xf32> to vector<24x16xf32>
    %cst_21 = arith.constant dense<0.000000e+00> : vector<24x24xf32>
    %47 = tpu.matmul %44, %45, %cst_21 {dimension_numbers = #tpu.dot_dimension_numbers<[1], [1], [0], [0], [0, 0, 1, 0], [], []>} : vector<24x16xf32>, vector<24x16xf32>, vector<24x24xf32> -> vector<24x24xf32>
    %cst_22 = arith.constant 2.500000e-01 : f32
    %48 = vector.broadcast %cst_22 : f32 to vector<24x24xf32>
    %49 = arith.mulf %47, %48 : vector<24x24xf32>
    %50 = vector.broadcast %8 : vector<1x24xf32> to vector<24x24xf32>
    %51 = arith.addf %49, %50 : vector<24x24xf32>
    %cst_23 = arith.constant dense<0xFF800000> : vector<24xf32>
    %52 = vector.multi_reduction <maximumf>, %51, %cst_23 [1] : vector<24x24xf32> to vector<24xf32>
    %53 = vector.shape_cast %52 : vector<24xf32> to vector<24x1xf32>
    %54 = vector.broadcast %53 : vector<24x1xf32> to vector<24x24xf32>
    %55 = arith.subf %51, %54 : vector<24x24xf32>
    %56 = math.exp %55 : vector<24x24xf32>
    %cst_24 = arith.constant dense<0.000000e+00> : vector<24xf32>
    %57 = vector.multi_reduction <add>, %56, %cst_24 [1] : vector<24x24xf32> to vector<24xf32>
    %58 = vector.shape_cast %57 : vector<24xf32> to vector<24x1xf32>
    %59 = tpu.reciprocal %58 {approx = true} : vector<24x1xf32> -> vector<24x1xf32>
    %60 = vector.broadcast %59 : vector<24x1xf32> to vector<24x24xf32>
    %61 = arith.mulf %56, %60 : vector<24x24xf32>
    %cst_25 = arith.constant dense<0.000000e+00> : vector<24x16xf32>
    %62 = tpu.matmul %61, %46, %cst_25 {dimension_numbers = #tpu.dot_dimension_numbers<[1], [0], [0], [1], [0, 0, 1, 1], [], []>} : vector<24x24xf32>, vector<24x16xf32>, vector<24x16xf32> -> vector<24x16xf32>
    %63 = vector.extract_strided_slice %43 {offsets = [0, 16], sizes = [24, 16], strides = [1, 1]} : vector<24x96xf32> to vector<24x16xf32>
    %64 = vector.extract_strided_slice %43 {offsets = [0, 48], sizes = [24, 16], strides = [1, 1]} : vector<24x96xf32> to vector<24x16xf32>
    %65 = vector.extract_strided_slice %43 {offsets = [0, 80], sizes = [24, 16], strides = [1, 1]} : vector<24x96xf32> to vector<24x16xf32>
    %cst_26 = arith.constant dense<0.000000e+00> : vector<24x24xf32>
    %66 = tpu.matmul %63, %64, %cst_26 {dimension_numbers = #tpu.dot_dimension_numbers<[1], [1], [0], [0], [0, 0, 1, 0], [], []>} : vector<24x16xf32>, vector<24x16xf32>, vector<24x24xf32> -> vector<24x24xf32>
    %cst_27 = arith.constant 2.500000e-01 : f32
    %67 = vector.broadcast %cst_27 : f32 to vector<24x24xf32>
    %68 = arith.mulf %66, %67 : vector<24x24xf32>
    %69 = vector.broadcast %8 : vector<1x24xf32> to vector<24x24xf32>
    %70 = arith.addf %68, %69 : vector<24x24xf32>
    %cst_28 = arith.constant dense<0xFF800000> : vector<24xf32>
    %71 = vector.multi_reduction <maximumf>, %70, %cst_28 [1] : vector<24x24xf32> to vector<24xf32>
    %72 = vector.shape_cast %71 : vector<24xf32> to vector<24x1xf32>
    %73 = vector.broadcast %72 : vector<24x1xf32> to vector<24x24xf32>
    %74 = arith.subf %70, %73 : vector<24x24xf32>
    %75 = math.exp %74 : vector<24x24xf32>
    %cst_29 = arith.constant dense<0.000000e+00> : vector<24xf32>
    %76 = vector.multi_reduction <add>, %75, %cst_29 [1] : vector<24x24xf32> to vector<24xf32>
    %77 = vector.shape_cast %76 : vector<24xf32> to vector<24x1xf32>
    %78 = tpu.reciprocal %77 {approx = true} : vector<24x1xf32> -> vector<24x1xf32>
    %79 = vector.broadcast %78 : vector<24x1xf32> to vector<24x24xf32>
    %80 = arith.mulf %75, %79 : vector<24x24xf32>
    %cst_30 = arith.constant dense<0.000000e+00> : vector<24x16xf32>
    %81 = tpu.matmul %80, %65, %cst_30 {dimension_numbers = #tpu.dot_dimension_numbers<[1], [0], [0], [1], [0, 0, 1, 1], [], []>} : vector<24x24xf32>, vector<24x16xf32>, vector<24x16xf32> -> vector<24x16xf32>
    %82 = tpu.concatenate %62, %81 in 1 : vector<24x16xf32>, vector<24x16xf32> -> vector<24x32xf32>
    %c0_31 = arith.constant 0 : index
    %c0_32 = arith.constant 0 : index
    %c0_33 = arith.constant 0 : index
    %83 = vector.load %arg10[%c0_31, %c0_32, %c0_33] : memref<1x32x32xf32, #tpu.memory_space<vmem>>, vector<1x32x32xf32>
    %84 = vector.shape_cast %83 : vector<1x32x32xf32> to vector<32x32xf32>
    %cst_34 = arith.constant dense<0.000000e+00> : vector<24x32xf32>
    %85 = tpu.matmul %82, %84, %cst_34 {dimension_numbers = #tpu.dot_dimension_numbers<[1], [0], [0], [1], [0, 0, 1, 1], [], []>} : vector<24x32xf32>, vector<32x32xf32>, vector<24x32xf32> -> vector<24x32xf32>
    %c0_35 = arith.constant 0 : index
    %c0_36 = arith.constant 0 : index
    %c0_37 = arith.constant 0 : index
    %86 = vector.load %arg11[%c0_35, %c0_36, %c0_37] : memref<1x1x32xf32, #tpu.memory_space<vmem>>, vector<1x1x32xf32>
    %87 = vector.shape_cast %86 : vector<1x1x32xf32> to vector<1x32xf32>
    %88 = vector.broadcast %87 : vector<1x32xf32> to vector<24x32xf32>
    %89 = arith.addf %85, %88 : vector<24x32xf32>
    %c0_38 = arith.constant 0 : index
    %c0_39 = arith.constant 0 : index
    %90 = vector.load %arg25[%c0_38, %c0_39] : memref<48x32xf32, #tpu.memory_space<vmem>>, vector<24x32xf32>
    %c0_40 = arith.constant 0 : index
    %c0_41 = arith.constant 0 : index
    %c0_42 = arith.constant 0 : index
    %91 = vector.load %arg12[%c0_40, %c0_41, %c0_42] : memref<1x1x32xf32, #tpu.memory_space<vmem>>, vector<1x1x32xf32>
    %92 = vector.shape_cast %91 : vector<1x1x32xf32> to vector<1x32xf32>
    %93 = vector.broadcast %92 : vector<1x32xf32> to vector<24x32xf32>
    %94 = arith.mulf %93, %89 : vector<24x32xf32>
    %95 = arith.addf %90, %94 : vector<24x32xf32>
    %c0_43 = arith.constant 0 : index
    %c0_44 = arith.constant 0 : index
    %96 = vector.load %arg25[%c0_43, %c0_44] : memref<48x32xf32, #tpu.memory_space<vmem>>, vector<24x32xf32>
    tpu.vector_store %arg25[%c0_43, %c0_44], %95 {strides = array<i32>} : memref<48x32xf32, #tpu.memory_space<vmem>>, vector<24x32xf32>,
    %97 = vector.extract_strided_slice %42 {offsets = [24, 0], sizes = [24, 96], strides = [1, 1]} : vector<48x96xf32> to vector<24x96xf32>
    %98 = vector.extract_strided_slice %97 {offsets = [0, 0], sizes = [24, 16], strides = [1, 1]} : vector<24x96xf32> to vector<24x16xf32>
    %99 = vector.extract_strided_slice %97 {offsets = [0, 32], sizes = [24, 16], strides = [1, 1]} : vector<24x96xf32> to vector<24x16xf32>
    %100 = vector.extract_strided_slice %97 {offsets = [0, 64], sizes = [24, 16], strides = [1, 1]} : vector<24x96xf32> to vector<24x16xf32>
    %cst_45 = arith.constant dense<0.000000e+00> : vector<24x24xf32>
    %101 = tpu.matmul %98, %99, %cst_45 {dimension_numbers = #tpu.dot_dimension_numbers<[1], [1], [0], [0], [0, 0, 1, 0], [], []>} : vector<24x16xf32>, vector<24x16xf32>, vector<24x24xf32> -> vector<24x24xf32>
    %cst_46 = arith.constant 2.500000e-01 : f32
    %102 = vector.broadcast %cst_46 : f32 to vector<24x24xf32>
    %103 = arith.mulf %101, %102 : vector<24x24xf32>
    %104 = vector.broadcast %8 : vector<1x24xf32> to vector<24x24xf32>
    %105 = arith.addf %103, %104 : vector<24x24xf32>
    %cst_47 = arith.constant dense<0xFF800000> : vector<24xf32>
    %106 = vector.multi_reduction <maximumf>, %105, %cst_47 [1] : vector<24x24xf32> to vector<24xf32>
    %107 = vector.shape_cast %106 : vector<24xf32> to vector<24x1xf32>
    %108 = vector.broadcast %107 : vector<24x1xf32> to vector<24x24xf32>
    %109 = arith.subf %105, %108 : vector<24x24xf32>
    %110 = math.exp %109 : vector<24x24xf32>
    %cst_48 = arith.constant dense<0.000000e+00> : vector<24xf32>
    %111 = vector.multi_reduction <add>, %110, %cst_48 [1] : vector<24x24xf32> to vector<24xf32>
    %112 = vector.shape_cast %111 : vector<24xf32> to vector<24x1xf32>
    %113 = tpu.reciprocal %112 {approx = true} : vector<24x1xf32> -> vector<24x1xf32>
    %114 = vector.broadcast %113 : vector<24x1xf32> to vector<24x24xf32>
    %115 = arith.mulf %110, %114 : vector<24x24xf32>
    %cst_49 = arith.constant dense<0.000000e+00> : vector<24x16xf32>
    %116 = tpu.matmul %115, %100, %cst_49 {dimension_numbers = #tpu.dot_dimension_numbers<[1], [0], [0], [1], [0, 0, 1, 1], [], []>} : vector<24x24xf32>, vector<24x16xf32>, vector<24x16xf32> -> vector<24x16xf32>
    %117 = vector.extract_strided_slice %97 {offsets = [0, 16], sizes = [24, 16], strides = [1, 1]} : vector<24x96xf32> to vector<24x16xf32>
    %118 = vector.extract_strided_slice %97 {offsets = [0, 48], sizes = [24, 16], strides = [1, 1]} : vector<24x96xf32> to vector<24x16xf32>
    %119 = vector.extract_strided_slice %97 {offsets = [0, 80], sizes = [24, 16], strides = [1, 1]} : vector<24x96xf32> to vector<24x16xf32>
    %cst_50 = arith.constant dense<0.000000e+00> : vector<24x24xf32>
    %120 = tpu.matmul %117, %118, %cst_50 {dimension_numbers = #tpu.dot_dimension_numbers<[1], [1], [0], [0], [0, 0, 1, 0], [], []>} : vector<24x16xf32>, vector<24x16xf32>, vector<24x24xf32> -> vector<24x24xf32>
    %cst_51 = arith.constant 2.500000e-01 : f32
    %121 = vector.broadcast %cst_51 : f32 to vector<24x24xf32>
    %122 = arith.mulf %120, %121 : vector<24x24xf32>
    %123 = vector.broadcast %8 : vector<1x24xf32> to vector<24x24xf32>
    %124 = arith.addf %122, %123 : vector<24x24xf32>
    %cst_52 = arith.constant dense<0xFF800000> : vector<24xf32>
    %125 = vector.multi_reduction <maximumf>, %124, %cst_52 [1] : vector<24x24xf32> to vector<24xf32>
    %126 = vector.shape_cast %125 : vector<24xf32> to vector<24x1xf32>
    %127 = vector.broadcast %126 : vector<24x1xf32> to vector<24x24xf32>
    %128 = arith.subf %124, %127 : vector<24x24xf32>
    %129 = math.exp %128 : vector<24x24xf32>
    %cst_53 = arith.constant dense<0.000000e+00> : vector<24xf32>
    %130 = vector.multi_reduction <add>, %129, %cst_53 [1] : vector<24x24xf32> to vector<24xf32>
    %131 = vector.shape_cast %130 : vector<24xf32> to vector<24x1xf32>
    %132 = tpu.reciprocal %131 {approx = true} : vector<24x1xf32> -> vector<24x1xf32>
    %133 = vector.broadcast %132 : vector<24x1xf32> to vector<24x24xf32>
    %134 = arith.mulf %129, %133 : vector<24x24xf32>
    %cst_54 = arith.constant dense<0.000000e+00> : vector<24x16xf32>
    %135 = tpu.matmul %134, %119, %cst_54 {dimension_numbers = #tpu.dot_dimension_numbers<[1], [0], [0], [1], [0, 0, 1, 1], [], []>} : vector<24x24xf32>, vector<24x16xf32>, vector<24x16xf32> -> vector<24x16xf32>
    %136 = tpu.concatenate %116, %135 in 1 : vector<24x16xf32>, vector<24x16xf32> -> vector<24x32xf32>
    %c0_55 = arith.constant 0 : index
    %c0_56 = arith.constant 0 : index
    %c0_57 = arith.constant 0 : index
    %137 = vector.load %arg10[%c0_55, %c0_56, %c0_57] : memref<1x32x32xf32, #tpu.memory_space<vmem>>, vector<1x32x32xf32>
    %138 = vector.shape_cast %137 : vector<1x32x32xf32> to vector<32x32xf32>
    %cst_58 = arith.constant dense<0.000000e+00> : vector<24x32xf32>
    %139 = tpu.matmul %136, %138, %cst_58 {dimension_numbers = #tpu.dot_dimension_numbers<[1], [0], [0], [1], [0, 0, 1, 1], [], []>} : vector<24x32xf32>, vector<32x32xf32>, vector<24x32xf32> -> vector<24x32xf32>
    %c0_59 = arith.constant 0 : index
    %c0_60 = arith.constant 0 : index
    %c0_61 = arith.constant 0 : index
    %140 = vector.load %arg11[%c0_59, %c0_60, %c0_61] : memref<1x1x32xf32, #tpu.memory_space<vmem>>, vector<1x1x32xf32>
    %141 = vector.shape_cast %140 : vector<1x1x32xf32> to vector<1x32xf32>
    %142 = vector.broadcast %141 : vector<1x32xf32> to vector<24x32xf32>
    %143 = arith.addf %139, %142 : vector<24x32xf32>
    %c24 = arith.constant 24 : index
    %c0_62 = arith.constant 0 : index
    %144 = vector.load %arg25[%c24, %c0_62] : memref<48x32xf32, #tpu.memory_space<vmem>>, vector<24x32xf32>
    %c0_63 = arith.constant 0 : index
    %c0_64 = arith.constant 0 : index
    %c0_65 = arith.constant 0 : index
    %145 = vector.load %arg12[%c0_63, %c0_64, %c0_65] : memref<1x1x32xf32, #tpu.memory_space<vmem>>, vector<1x1x32xf32>
    %146 = vector.shape_cast %145 : vector<1x1x32xf32> to vector<1x32xf32>
    %147 = vector.broadcast %146 : vector<1x32xf32> to vector<24x32xf32>
    %148 = arith.mulf %147, %143 : vector<24x32xf32>
    %149 = arith.addf %144, %148 : vector<24x32xf32>
    %c24_66 = arith.constant 24 : index
    %c0_67 = arith.constant 0 : index
    %150 = vector.load %arg25[%c24_66, %c0_67] : memref<48x32xf32, #tpu.memory_space<vmem>>, vector<24x32xf32>
    tpu.vector_store %arg25[%c24_66, %c0_67], %149 {strides = array<i32>} : memref<48x32xf32, #tpu.memory_space<vmem>>, vector<24x32xf32>,
    %c0_68 = arith.constant 0 : index
    %c0_69 = arith.constant 0 : index
    %151 = vector.load %arg25[%c0_68, %c0_69] : memref<48x32xf32, #tpu.memory_space<vmem>>, vector<48x32xf32>
    %c0_70 = arith.constant 0 : index
    %c0_71 = arith.constant 0 : index
    %c0_72 = arith.constant 0 : index
    %152 = vector.load %arg13[%c0_70, %c0_71, %c0_72] : memref<1x1x32xf32, #tpu.memory_space<vmem>>, vector<1x1x32xf32>
    %153 = vector.shape_cast %152 : vector<1x1x32xf32> to vector<1x32xf32>
    %c0_73 = arith.constant 0 : index
    %c0_74 = arith.constant 0 : index
    %c0_75 = arith.constant 0 : index
    %154 = vector.load %arg14[%c0_73, %c0_74, %c0_75] : memref<1x1x32xf32, #tpu.memory_space<vmem>>, vector<1x1x32xf32>
    %155 = vector.shape_cast %154 : vector<1x1x32xf32> to vector<1x32xf32>
    %cst_76 = arith.constant dense<0.000000e+00> : vector<48xf32>
    %156 = vector.multi_reduction <add>, %151, %cst_76 [1] : vector<48x32xf32> to vector<48xf32>
    %157 = vector.shape_cast %156 : vector<48xf32> to vector<48x1xf32>
    %cst_77 = arith.constant 3.200000e+01 : f32
    %158 = vector.broadcast %cst_77 : f32 to vector<48x1xf32>
    %159 = arith.divf %157, %158 : vector<48x1xf32>
    %160 = vector.broadcast %159 : vector<48x1xf32> to vector<48x32xf32>
    %161 = arith.subf %151, %160 : vector<48x32xf32>
    %162 = arith.mulf %161, %161 : vector<48x32xf32>
    %cst_78 = arith.constant dense<0.000000e+00> : vector<48xf32>
    %163 = vector.multi_reduction <add>, %162, %cst_78 [1] : vector<48x32xf32> to vector<48xf32>
    %164 = vector.shape_cast %163 : vector<48xf32> to vector<48x1xf32>
    %cst_79 = arith.constant 3.200000e+01 : f32
    %165 = vector.broadcast %cst_79 : f32 to vector<48x1xf32>
    %166 = arith.divf %164, %165 : vector<48x1xf32>
    %167 = vector.broadcast %159 : vector<48x1xf32> to vector<48x32xf32>
    %168 = arith.subf %151, %167 : vector<48x32xf32>
    %cst_80 = arith.constant 9.99999997E-7 : f32
    %169 = vector.broadcast %cst_80 : f32 to vector<48x1xf32>
    %170 = arith.addf %166, %169 : vector<48x1xf32>
    %171 = math.rsqrt %170 : vector<48x1xf32>
    %172 = vector.broadcast %171 : vector<48x1xf32> to vector<48x32xf32>
    %173 = arith.mulf %168, %172 : vector<48x32xf32>
    %174 = vector.broadcast %153 : vector<1x32xf32> to vector<48x32xf32>
    %175 = arith.mulf %173, %174 : vector<48x32xf32>
    %176 = vector.broadcast %155 : vector<1x32xf32> to vector<48x32xf32>
    %177 = arith.addf %175, %176 : vector<48x32xf32>
    %c0_81 = arith.constant 0 : index
    %c0_82 = arith.constant 0 : index
    %c0_83 = arith.constant 0 : index
    %178 = vector.load %arg15[%c0_81, %c0_82, %c0_83] : memref<1x32x128xf32, #tpu.memory_space<vmem>>, vector<1x32x128xf32>
    %179 = vector.shape_cast %178 : vector<1x32x128xf32> to vector<32x128xf32>
    %cst_84 = arith.constant dense<0.000000e+00> : vector<48x128xf32>
    %180 = tpu.matmul %177, %179, %cst_84 {dimension_numbers = #tpu.dot_dimension_numbers<[1], [0], [0], [1], [0, 0, 1, 1], [], []>} : vector<48x32xf32>, vector<32x128xf32>, vector<48x128xf32> -> vector<48x128xf32>
    %c0_85 = arith.constant 0 : index
    %c0_86 = arith.constant 0 : index
    %c0_87 = arith.constant 0 : index
    %181 = vector.load %arg16[%c0_85, %c0_86, %c0_87] : memref<1x1x128xf32, #tpu.memory_space<vmem>>, vector<1x1x128xf32>
    %182 = vector.shape_cast %181 : vector<1x1x128xf32> to vector<1x128xf32>
    %183 = vector.broadcast %182 : vector<1x128xf32> to vector<48x128xf32>
    %184 = arith.addf %180, %183 : vector<48x128xf32>
    %185 = arith.mulf %184, %184 : vector<48x128xf32>
    %186 = arith.mulf %184, %185 : vector<48x128xf32>
    %cst_88 = arith.constant 4.471500e-02 : f32
    %187 = vector.broadcast %cst_88 : f32 to vector<48x128xf32>
    %188 = arith.mulf %187, %186 : vector<48x128xf32>
    %189 = arith.addf %184, %188 : vector<48x128xf32>
    %cst_89 = arith.constant 0.797884583 : f32
    %190 = vector.broadcast %cst_89 : f32 to vector<48x128xf32>
    %191 = arith.mulf %190, %189 : vector<48x128xf32>
    %192 = math.tanh %191 : vector<48x128xf32>
    %cst_90 = arith.constant 1.000000e+00 : f32
    %193 = vector.broadcast %cst_90 : f32 to vector<48x128xf32>
    %194 = arith.addf %193, %192 : vector<48x128xf32>
    %cst_91 = arith.constant 5.000000e-01 : f32
    %195 = vector.broadcast %cst_91 : f32 to vector<48x128xf32>
    %196 = arith.mulf %195, %194 : vector<48x128xf32>
    %197 = arith.mulf %184, %196 : vector<48x128xf32>
    %c0_92 = arith.constant 0 : index
    %c0_93 = arith.constant 0 : index
    %c0_94 = arith.constant 0 : index
    %198 = vector.load %arg17[%c0_92, %c0_93, %c0_94] : memref<1x128x32xf32, #tpu.memory_space<vmem>>, vector<1x128x32xf32>
    %199 = vector.shape_cast %198 : vector<1x128x32xf32> to vector<128x32xf32>
    %cst_95 = arith.constant dense<0.000000e+00> : vector<48x32xf32>
    %200 = tpu.matmul %197, %199, %cst_95 {dimension_numbers = #tpu.dot_dimension_numbers<[1], [0], [0], [1], [0, 0, 1, 1], [], []>} : vector<48x128xf32>, vector<128x32xf32>, vector<48x32xf32> -> vector<48x32xf32>
    %c0_96 = arith.constant 0 : index
    %c0_97 = arith.constant 0 : index
    %c0_98 = arith.constant 0 : index
    %201 = vector.load %arg18[%c0_96, %c0_97, %c0_98] : memref<1x1x32xf32, #tpu.memory_space<vmem>>, vector<1x1x32xf32>
    %202 = vector.shape_cast %201 : vector<1x1x32xf32> to vector<1x32xf32>
    %203 = vector.broadcast %202 : vector<1x32xf32> to vector<48x32xf32>
    %204 = arith.addf %200, %203 : vector<48x32xf32>
    %c0_99 = arith.constant 0 : index
    %c0_100 = arith.constant 0 : index
    %205 = vector.load %arg25[%c0_99, %c0_100] : memref<48x32xf32, #tpu.memory_space<vmem>>, vector<48x32xf32>
    %c0_101 = arith.constant 0 : index
    %c0_102 = arith.constant 0 : index
    %c0_103 = arith.constant 0 : index
    %206 = vector.load %arg19[%c0_101, %c0_102, %c0_103] : memref<1x1x32xf32, #tpu.memory_space<vmem>>, vector<1x1x32xf32>
    %207 = vector.shape_cast %206 : vector<1x1x32xf32> to vector<1x32xf32>
    %208 = vector.broadcast %207 : vector<1x32xf32> to vector<48x32xf32>
    %209 = arith.mulf %208, %204 : vector<48x32xf32>
    %210 = arith.addf %205, %209 : vector<48x32xf32>
    %c0_104 = arith.constant 0 : index
    %c0_105 = arith.constant 0 : index
    %211 = vector.load %arg25[%c0_104, %c0_105] : memref<48x32xf32, #tpu.memory_space<vmem>>, vector<48x32xf32>
    tpu.vector_store %arg25[%c0_104, %c0_105], %210 {strides = array<i32>} : memref<48x32xf32, #tpu.memory_space<vmem>>, vector<48x32xf32>,
    %c1_i32 = arith.constant 1 : i32
    %212 = arith.cmpi eq, %arg0, %c1_i32 : i32
    %213 = arith.extui %212 : i1 to i32
    %c0_i32_106 = arith.constant 0 : i32
    %214 = arith.cmpi ne, %213, %c0_i32_106 : i32
    scf.if %214 {
      %c0_107 = arith.constant 0 : index
      %c0_108 = arith.constant 0 : index
      %215 = vector.load %arg25[%c0_107, %c0_108] : memref<48x32xf32, #tpu.memory_space<vmem>>, vector<48x32xf32>
      %c0_109 = arith.constant 0 : index
      %c0_110 = arith.constant 0 : index
      %216 = vector.load %arg20[%c0_109, %c0_110] : memref<1x32xf32, #tpu.memory_space<vmem>>, vector<1x32xf32>
      %c0_111 = arith.constant 0 : index
      %c0_112 = arith.constant 0 : index
      %217 = vector.load %arg21[%c0_111, %c0_112] : memref<1x32xf32, #tpu.memory_space<vmem>>, vector<1x32xf32>
      %cst_113 = arith.constant dense<0.000000e+00> : vector<48xf32>
      %218 = vector.multi_reduction <add>, %215, %cst_113 [1] : vector<48x32xf32> to vector<48xf32>
      %219 = vector.shape_cast %218 : vector<48xf32> to vector<48x1xf32>
      %cst_114 = arith.constant 3.200000e+01 : f32
      %220 = vector.broadcast %cst_114 : f32 to vector<48x1xf32>
      %221 = arith.divf %219, %220 : vector<48x1xf32>
      %222 = vector.broadcast %221 : vector<48x1xf32> to vector<48x32xf32>
      %223 = arith.subf %215, %222 : vector<48x32xf32>
      %224 = arith.mulf %223, %223 : vector<48x32xf32>
      %cst_115 = arith.constant dense<0.000000e+00> : vector<48xf32>
      %225 = vector.multi_reduction <add>, %224, %cst_115 [1] : vector<48x32xf32> to vector<48xf32>
      %226 = vector.shape_cast %225 : vector<48xf32> to vector<48x1xf32>
      %cst_116 = arith.constant 3.200000e+01 : f32
      %227 = vector.broadcast %cst_116 : f32 to vector<48x1xf32>
      %228 = arith.divf %226, %227 : vector<48x1xf32>
      %229 = vector.broadcast %221 : vector<48x1xf32> to vector<48x32xf32>
      %230 = arith.subf %215, %229 : vector<48x32xf32>
      %cst_117 = arith.constant 9.99999997E-7 : f32
      %231 = vector.broadcast %cst_117 : f32 to vector<48x1xf32>
      %232 = arith.addf %228, %231 : vector<48x1xf32>
      %233 = math.rsqrt %232 : vector<48x1xf32>
      %234 = vector.broadcast %233 : vector<48x1xf32> to vector<48x32xf32>
      %235 = arith.mulf %230, %234 : vector<48x32xf32>
      %236 = vector.broadcast %216 : vector<1x32xf32> to vector<48x32xf32>
      %237 = arith.mulf %235, %236 : vector<48x32xf32>
      %238 = vector.broadcast %217 : vector<1x32xf32> to vector<48x32xf32>
      %239 = arith.addf %237, %238 : vector<48x32xf32>
      %240 = vector.extract_strided_slice %239 {offsets = [0, 0], sizes = [16, 32], strides = [1, 1]} : vector<48x32xf32> to vector<16x32xf32>
      %241 = vector.extract_strided_slice %239 {offsets = [24, 0], sizes = [16, 32], strides = [1, 1]} : vector<48x32xf32> to vector<16x32xf32>
      %242 = tpu.concatenate %240, %241 in 0 : vector<16x32xf32>, vector<16x32xf32> -> vector<32x32xf32>
      %c0_118 = arith.constant 0 : index
      %c0_119 = arith.constant 0 : index
      %243 = vector.load %arg22[%c0_118, %c0_119] : memref<32x128xf32, #tpu.memory_space<vmem>>, vector<32x128xf32>
      %cst_120 = arith.constant dense<0.000000e+00> : vector<32x128xf32>
      %244 = tpu.matmul %242, %243, %cst_120 {dimension_numbers = #tpu.dot_dimension_numbers<[1], [0], [0], [1], [0, 0, 1, 1], [], []>} : vector<32x32xf32>, vector<32x128xf32>, vector<32x128xf32> -> vector<32x128xf32>
      %c0_121 = arith.constant 0 : index
      %c0_122 = arith.constant 0 : index
      %245 = vector.load %arg23[%c0_121, %c0_122] : memref<1x128xf32, #tpu.memory_space<vmem>>, vector<1x128xf32>
      %246 = vector.broadcast %245 : vector<1x128xf32> to vector<32x128xf32>
      %247 = arith.addf %244, %246 : vector<32x128xf32>
      %c0_123 = arith.constant 0 : index
      %c0_124 = arith.constant 0 : index
      %248 = vector.load %arg24[%c0_123, %c0_124] : memref<32x128xf32, #tpu.memory_space<vmem>>, vector<32x128xf32>
      tpu.vector_store %arg24[%c0_123, %c0_124], %247 {strides = array<i32>} : memref<32x128xf32, #tpu.memory_space<vmem>>, vector<32x128xf32>,
    } else {
    }
    return
  }
  func.func @transform_0(%arg0: i32) -> (i32, i32) {
    %c0_i32 = arith.constant 0 : i32
    %c0_i32_0 = arith.constant 0 : i32
    %c0_i32_1 = arith.constant 0 : i32
    return %c0_i32, %c0_i32_0 : i32, i32
  }
  func.func @transform_1(%arg0: i32) -> (i32, i32) {
    %c0_i32 = arith.constant 0 : i32
    %c0_i32_0 = arith.constant 0 : i32
    %c0_i32_1 = arith.constant 0 : i32
    return %c0_i32, %c0_i32_0 : i32, i32
  }
  func.func @transform_2(%arg0: i32) -> (i32, i32) {
    %c0_i32 = arith.constant 0 : i32
    %c0_i32_0 = arith.constant 0 : i32
    %c0_i32_1 = arith.constant 0 : i32
    return %c0_i32, %c0_i32_0 : i32, i32
  }
  func.func @transform_3(%arg0: i32) -> (i32, i32) {
    %c0_i32 = arith.constant 0 : i32
    %c0_i32_0 = arith.constant 0 : i32
    %c0_i32_1 = arith.constant 0 : i32
    return %c0_i32, %c0_i32_0 : i32, i32
  }
  func.func @transform_4(%arg0: i32) -> (i32, i32) {
    %c0_i32 = arith.constant 0 : i32
    %c0_i32_0 = arith.constant 0 : i32
    %c0_i32_1 = arith.constant 0 : i32
    return %c0_i32, %c0_i32_0 : i32, i32
  }
  func.func @transform_5(%arg0: i32) -> (i32, i32, i32) {
    %c0_i32 = arith.constant 0 : i32
    %c0_i32_0 = arith.constant 0 : i32
    %c0_i32_1 = arith.constant 0 : i32
    return %arg0, %c0_i32, %c0_i32_0 : i32, i32, i32
  }
  func.func @transform_6(%arg0: i32) -> (i32, i32, i32) {
    %c0_i32 = arith.constant 0 : i32
    %c0_i32_0 = arith.constant 0 : i32
    %c0_i32_1 = arith.constant 0 : i32
    return %arg0, %c0_i32, %c0_i32_0 : i32, i32, i32
  }
  func.func @transform_7(%arg0: i32) -> (i32, i32, i32) {
    %c0_i32 = arith.constant 0 : i32
    %c0_i32_0 = arith.constant 0 : i32
    %c0_i32_1 = arith.constant 0 : i32
    return %arg0, %c0_i32, %c0_i32_0 : i32, i32, i32
  }
  func.func @transform_8(%arg0: i32) -> (i32, i32, i32) {
    %c0_i32 = arith.constant 0 : i32
    %c0_i32_0 = arith.constant 0 : i32
    %c0_i32_1 = arith.constant 0 : i32
    return %arg0, %c0_i32, %c0_i32_0 : i32, i32, i32
  }
  func.func @transform_9(%arg0: i32) -> (i32, i32, i32) {
    %c0_i32 = arith.constant 0 : i32
    %c0_i32_0 = arith.constant 0 : i32
    %c0_i32_1 = arith.constant 0 : i32
    return %arg0, %c0_i32, %c0_i32_0 : i32, i32, i32
  }
  func.func @transform_10(%arg0: i32) -> (i32, i32, i32) {
    %c0_i32 = arith.constant 0 : i32
    %c0_i32_0 = arith.constant 0 : i32
    %c0_i32_1 = arith.constant 0 : i32
    return %arg0, %c0_i32, %c0_i32_0 : i32, i32, i32
  }
  func.func @transform_11(%arg0: i32) -> (i32, i32, i32) {
    %c0_i32 = arith.constant 0 : i32
    %c0_i32_0 = arith.constant 0 : i32
    %c0_i32_1 = arith.constant 0 : i32
    return %arg0, %c0_i32, %c0_i32_0 : i32, i32, i32
  }
  func.func @transform_12(%arg0: i32) -> (i32, i32, i32) {
    %c0_i32 = arith.constant 0 : i32
    %c0_i32_0 = arith.constant 0 : i32
    %c0_i32_1 = arith.constant 0 : i32
    return %arg0, %c0_i32, %c0_i32_0 : i32, i32, i32
  }
  func.func @transform_13(%arg0: i32) -> (i32, i32, i32) {
    %c0_i32 = arith.constant 0 : i32
    %c0_i32_0 = arith.constant 0 : i32
    %c0_i32_1 = arith.constant 0 : i32
    return %arg0, %c0_i32, %c0_i32_0 : i32, i32, i32
  }
  func.func @transform_14(%arg0: i32) -> (i32, i32, i32) {
    %c0_i32 = arith.constant 0 : i32
    %c0_i32_0 = arith.constant 0 : i32
    %c0_i32_1 = arith.constant 0 : i32
    return %arg0, %c0_i32, %c0_i32_0 : i32, i32, i32
  }
  func.func @transform_15(%arg0: i32) -> (i32, i32, i32) {
    %c0_i32 = arith.constant 0 : i32
    %c0_i32_0 = arith.constant 0 : i32
    %c0_i32_1 = arith.constant 0 : i32
    return %arg0, %c0_i32, %c0_i32_0 : i32, i32, i32
  }
  func.func @transform_16(%arg0: i32) -> (i32, i32, i32) {
    %c0_i32 = arith.constant 0 : i32
    %c0_i32_0 = arith.constant 0 : i32
    %c0_i32_1 = arith.constant 0 : i32
    return %arg0, %c0_i32, %c0_i32_0 : i32, i32, i32
  }
  func.func @transform_17(%arg0: i32) -> (i32, i32, i32) {
    %c0_i32 = arith.constant 0 : i32
    %c0_i32_0 = arith.constant 0 : i32
    %c0_i32_1 = arith.constant 0 : i32
    return %arg0, %c0_i32, %c0_i32_0 : i32, i32, i32
  }
  func.func @transform_18(%arg0: i32) -> (i32, i32, i32) {
    %c0_i32 = arith.constant 0 : i32
    %c0_i32_0 = arith.constant 0 : i32
    %c0_i32_1 = arith.constant 0 : i32
    return %arg0, %c0_i32, %c0_i32_0 : i32, i32, i32
  }
  func.func @transform_19(%arg0: i32) -> (i32, i32) {
    %c0_i32 = arith.constant 0 : i32
    %c0_i32_0 = arith.constant 0 : i32
    %c0_i32_1 = arith.constant 0 : i32
    return %c0_i32, %c0_i32_0 : i32, i32
  }
  func.func @transform_20(%arg0: i32) -> (i32, i32) {
    %c0_i32 = arith.constant 0 : i32
    %c0_i32_0 = arith.constant 0 : i32
    %c0_i32_1 = arith.constant 0 : i32
    return %c0_i32, %c0_i32_0 : i32, i32
  }
  func.func @transform_21(%arg0: i32) -> (i32, i32) {
    %c0_i32 = arith.constant 0 : i32
    %c0_i32_0 = arith.constant 0 : i32
    %c0_i32_1 = arith.constant 0 : i32
    return %c0_i32, %c0_i32_0 : i32, i32
  }
  func.func @transform_22(%arg0: i32) -> (i32, i32) {
    %c0_i32 = arith.constant 0 : i32
    %c0_i32_0 = arith.constant 0 : i32
    %c0_i32_1 = arith.constant 0 : i32
    return %c0_i32, %c0_i32_0 : i32, i32
  }
  func.func @transform_23(%arg0: i32) -> (i32, i32) {
    %c0_i32 = arith.constant 0 : i32
    %c0_i32_0 = arith.constant 0 : i32
    %c0_i32_1 = arith.constant 0 : i32
    return %c0_i32, %c0_i32_0 : i32, i32
  }
}

</mosaic_0001>

<bundles_post_ra>
// kernel: tpu_custom_call.1
= control target key start
LH: loop header
LB: loop body
LE: loop exit
PB: predicated region body
PF: predicated region fallthrough
CT: control target
= control target key end

     0   :  { %s4959_s0 = inlined_call_operand.vmem [shape: f32[32,48], index: 0, kind: input, shape index: {}]   ;;  %s4960_s1 = inlined_call_operand.vmem [shape: f32[48,32], index: 1, kind: input, shape index: {}]   ;;  %s4961_s2 = inlined_call_operand.vmem [shape: f32[1,32], index: 2, kind: input, shape index: {}]   ;;  %s4962_s3 = inlined_call_operand.vmem [shape: f32[8,32], index: 3, kind: input, shape index: {}]   ;;  %s4963_s4 = inlined_call_operand.vmem [shape: f32[24,32], index: 4, kind: input, shape index: {}]   ;;  %s4964_s5 = inlined_call_operand.vmem [shape: f32[2,1,32], index: 5, kind: input, shape index: {}]   ;;  %s4965_s6 = inlined_call_operand.vmem [shape: f32[2,1,32], index: 6, kind: input, shape index: {}]   ;;  %s4966_s7 = inlined_call_operand.vmem [shape: f32[2,32,96], index: 7, kind: input, shape index: {}]   ;;  %s4967_s8 = inlined_call_operand.vmem [shape: f32[2,1,96], index: 8, kind: input, shape index: {}]   ;;  %s4968_s9 = inlined_call_operand.vmem [shape: f32[2,32,32], index: 9, kind: input, shape index: {}]   ;;  %s4969_s10 = inlined_call_operand.vmem [shape: f32[2,1,32], index: 10, kind: input, shape index: {}]   ;;  %s4970_s11 = inlined_call_operand.vmem [shape: f32[2,1,32], index: 11, kind: input, shape index: {}]   ;;  %s4971_s12 = inlined_call_operand.vmem [shape: f32[2,1,32], index: 12, kind: input, shape index: {}]   ;;  %s4972_s13 = inlined_call_operand.vmem [shape: f32[2,1,32], index: 13, kind: input, shape index: {}]   ;;  %s4973_s14 = inlined_call_operand.vmem [shape: f32[2,32,128], index: 14, kind: input, shape index: {}]   ;;  %s4974_s15 = inlined_call_operand.vmem [shape: f32[2,1,128], index: 15, kind: input, shape index: {}]   ;;  %s4975_s16 = inlined_call_operand.vmem [shape: f32[2,128,32], index: 16, kind: input, shape index: {}]   ;;  %s4976_s17 = inlined_call_operand.vmem [shape: f32[2,1,32], index: 17, kind: input, shape index: {}]   ;;  %s4977_s18 = inlined_call_operand.vmem [shape: f32[2,1,32], index: 18, kind: input, shape index: {}]   ;;  %s4978_s19 = inlined_call_operand.vmem [shape: f32[1,32], index: 19, kind: input, shape index: {}]   ;;  %s4979_s20 = inlined_call_operand.vmem [shape: f32[1,32], index: 20, kind: input, shape index: {}]   ;;  %s4980_s21 = inlined_call_operand.vmem [shape: f32[32,128], index: 21, kind: input, shape index: {}]   ;;  %s4981_s22 = inlined_call_operand.vmem [shape: f32[1,128], index: 22, kind: input, shape index: {}]   ;;  %s4982_s23 = inlined_call_operand.hbm [shape: f32[32,128], index: 23, kind: output, shape index: {}]  }
   0x1   :  { %4989 = sst [smem:[#allocation7_spill]] %s4959_s0 }
   0x2   :  { %4990 = sst [smem:[#allocation8_spill]] %s4960_s1 }
   0x3   :  { %4991 = sst [smem:[#allocation9_spill]] %s4961_s2 }
   0x4   :  { %4992 = sst [smem:[#allocation10_spill]] %s4962_s3 }
   0x5   :  { %4993 = sst [smem:[#allocation11_spill]] %s4963_s4 }
   0x6   :  { %4994 = sst [smem:[#allocation12_spill]] %s4964_s5 }
   0x7   :  { %4995 = sst [smem:[#allocation13_spill]] %s4965_s6 }
   0x8   :  { %4996 = sst [smem:[#allocation14_spill]] %s4966_s7 }
   0x9   :  { %4997 = sst [smem:[#allocation15_spill]] %s4968_s9 }
   0xa   :  { %4998 = sst [smem:[#allocation16_spill]] %s4978_s19 }
   0xb   :  { %4999 = sst [smem:[#allocation17_spill]] %s4979_s20 }
   0xc   :  { %5000 = sst [smem:[#allocation18_spill]] %s4980_s21 }
   0xd   :  { %5001 = sst [smem:[#allocation19_spill]] %s4981_s22 }
   0xe   :  { %5002 = sst [smem:[#allocation20_spill]] %s4982_s23 }
   0xf   :  { %28 = vsyncpa [#allocation4], 0  ;;  %s4235_s4 = smov 0  }
  0x10 LB: > { %5003 = sst [smem:[#allocation6_spill]] %s4100_s4  ;;  %s4241_s30 = sadd.s32 4294967295, %s4100_s4   ;;  %s4100_s4 = sphi %s4235_s4, %s34_s4  }
  0x11   : > { %p3307_p0 = scmp.ge.s32.totalorder %s4100_s4, 1  ;;  %p743_p1 = scmp.lt.s32.totalorder %s4100_s4, 3 }
  0x13   : > { %p744_p2 = pnand %p3307_p0, %p743_p1 }
  0x14   : > { %p847_p3 = scmp.lt.s32.totalorder (!%p744_p2), %s4241_s30, 1  ;;  %s5006_s4 = sld [smem:[#allocation14_spill]] (!%p744_p2) }
  0x15   : > { %747 = sbr.rel (%p744_p2) target bundleno = 4047 (0xfcf), region = 112  ;;  %s5007_s9 = sld [smem:[#allocation15_spill]] (!%p744_p2) }
  0x16   : > { %p3316_p4 = scmp.ne.s32.totalorder (!%p744_p2), %s4241_s30, 0 }
  0x1c   : > { %s4247_s24 = scalar_select %p847_p3, %s4241_s30, 1 }
  0x1d   : > { %900 = sbr.rel (%p3316_p4) target bundleno = 268 (0x10c), region = 116  ;;  %s5008_s20 = sld [smem:[#allocation8_spill]] (!%p3316_p4)  ;;  %vm918_vm0 = vcmask (!%p3316_p4), 392192   ;;  %vm1023_vm1 = vcmask (!%p3316_p4), 261120  }
  0x1e   : > { %s3400_s28 = sshll.u32 %s4247_s24, 5  ;;  %s877_s5 = scalar_lea.vmem %s4972_s13, %s4247_s24 }
  0x1f   : > { %s4265_s23 = scalar_lea.vmem %s5006_s4, %s3400_s28  ;;  %s4270_s19 = scalar_lea.vmem %s5007_s9, %s3400_s28 }
  0x20   : > { %s4291_s22 = scalar_lea.vmem %s4973_s14, %s3400_s28  ;;  %s3403_s2 = sshll.u32 %s4247_s24, 7 }
  0x21   : > { %s893_s7 = scalar_lea.vmem %s4976_s17, %s4247_s24  ;;  %s4305_s0 = scalar_lea.vmem %s4975_s16, %s3403_s2 }
  0x22   : > { %s5009_s26 = sld [smem:[#allocation7_spill]] (!%p3316_p4)  ;;  %s5010_s1 = sld [smem:[#allocation10_spill]] (!%p3316_p4) }
  0x23   : > { %v905_v0 = vld [vmem:[%s5008_s20] sm:$0xff] (!%p3316_p4)  ;;  %v906_v1 = vld [vmem:[%s5008_s20 + $0x8] sm:$0xff] (!%p3316_p4)  ;;  %v907_v2 = vld [vmem:[%s5008_s20 + $0x10] sm:$0xff] (!%p3316_p4)  ;;  %s5011_s27 = sld [smem:[#allocation11_spill]] (!%p3316_p4)  ;;  %s5012_s3 = sld [smem:[#allocation9_spill]] (!%p3316_p4) }
  0x24   : > { %v3787_v3 = vpack.c.bf16 %v906_v1, %v905_v0  ;;  %v908_v4 = vld [vmem:[%s5008_s20 + $0x18] sm:$0xff]  ;;  %v909_v6 = vld [vmem:[%s5008_s20 + $0x20] sm:$0xff]  ;;  %v910_v7 = vld [vmem:[%s5008_s20 + $0x28] sm:$0xff] }
  0x25   : > { %v3791_v5 = vpack.c.bf16 %v908_v4, %v907_v2  ;;  %v3795_v10 = vpack.c.bf16 %v910_v7, %v909_v6 }
  0x26   : > { %3788 = vmatprep.subr.bf16.mxu0 %v3787_v3  ;;  %3895 = vmatprep.subr.bf16.mxu1 %v3787_v3 }
  0x27   : > { %3790 = vmatpush3.bf16.msra.mxu0 %v3787_v3  ;;  %3898 = vmatpush3.bf16.msra.mxu1 %v3787_v3 }
  0x28   : > { %v901_v8 = vld [vmem:[%s5009_s26] sm:$0xff]  ;;  %v903_v9 = vld [vmem:[%s5009_s26 + $0x10] sm:$0xff]  ;;  %3792 = vmatprep.subr.bf16.mxu0 %v3791_v5  ;;  %3896 = vmatprep.subr.bf16.mxu1 %v3791_v5  ;;  %v902_v11 = vld [vmem:[%s5009_s26 + $0x8] sm:$0xff] }
  0x29   : > { %3538 = vmatprep.mubr.msk.f32.mxu0 %vm918_vm0, %v901_v8  ;;  %3541 = vmatprep.mubr.msk.f32.mxu1 %vm918_vm0, %v903_v9  ;;  %v904_v12 = vld [vmem:[%s5009_s26 + $0x18] sm:$0xff]  ;;  %v1016_v13 = vld [vmem:[%s5010_s1] sm:$0xff]  ;;  %v1019_v14 = vld [vmem:[%s5011_s27 + $0x10] sm:$0xff] }
  0x2a   : > { %v1022_v15 = vadd.f32 %v1019_v14, %v1016_v13  ;;  %v3317_v16 = vld [vmem:[%s5012_s3] ss:$0 sm:$0xff]  ;;  %v1018_v18 = vld [vmem:[%s5011_s27 + $0x8] sm:$0xff] }
  0x2b   : > { %3794 = vmatpush3.bf16.msra.mxu0 %v3791_v5  ;;  %3899 = vmatpush3.bf16.msra.mxu1 %v3791_v5  ;;  %v1017_v23 = vld [vmem:[%s5011_s27] sm:$0xff] }
  0x2c   : > { %3796 = vmatprep.subr.bf16.mxu0 %v3795_v10  ;;  %3897 = vmatprep.subr.bf16.mxu1 %v3795_v10  ;;  %1026 = vst.msk [vmem:[#allocation2 + $0x10] sm:$0xff] %vm1023_vm1, %v1022_v15  ;;  %1036 = vst.msk [vmem:[#allocation2 + $0x28] sm:$0xff] %vm1023_vm1, %v1022_v15 }
  0x2f   : > { %3798 = vmatpush3.bf16.msra.mxu0 %v3795_v10  ;;  %3900 = vmatpush3.bf16.msra.mxu1 %v3795_v10 }
  0x32   : > { %3539 = vmatmul.mubr.msk.f32.vlgmr.msra.gmra.mrb[0].mxu0 %vm918_vm0, %v902_v11  ;;  %3542 = vmatmul.mubr.msk.f32.vlgmr.msra.gmra.mrb[0].mxu1 %vm918_vm0, %v904_v12 }
 0x105   : > { %v3540_v17 = vpop.f32.mrb[0].mxu0  ;;  %v3543_v19 = vpop.f32.mrb[0].mxu1 }
 0x106   : > { %v1003_v20 = vadd.f32 %v3540_v17, %v3317_v16  ;;  %v1013_v21 = vadd.f32 %v3543_v19, %v3317_v16  ;;  %v997_v22 = vpop.f32.mrb[1].mxu0  ;;  %v1007_v24 = vpop.f32.mrb[1].mxu1 }
 0x107   : > { %v998_v25 = vadd.f32 %v3317_v16, %v997_v22  ;;  %v1008_v26 = vadd.f32 %v3317_v16, %v1007_v24 }
 0x108   : > { %v1021_v27 = vadd.f32 %v1018_v18, %v1003_v20  ;;  %v1032_v28 = vadd.f32 %v1018_v18, %v1013_v21 }
 0x109   : > { %v1020_v29 = vadd.f32 %v1017_v23, %v998_v25  ;;  %v1031_v30 = vadd.f32 %v1017_v23, %v1008_v26 }
 0x10a   : > { %1025 = vst.msk [vmem:[#allocation2 + $0x8] sm:$0xff] %vm1023_vm1, %v1021_v27  ;;  %1035 = vst.msk [vmem:[#allocation2 + $0x20] sm:$0xff] %vm1023_vm1, %v1032_v28 }
 0x10b   : > { %1024 = vst.msk [vmem:[#allocation2] sm:$0xff] %vm1023_vm1, %v1020_v29  ;;  %1034 = vst.msk [vmem:[#allocation2 + $0x18] sm:$0xff] %vm1023_vm1, %v1031_v30 }
 0x10c PF: > { %vm1049_vm2 = vcmask 261120   ;;  %v1043_v32 = vld [vmem:[#allocation2 + $0x10] sm:$0xff]  ;;  %v1046_v61 = vld [vmem:[#allocation2 + $0x28] sm:$0xff]  ;;  %v1153_v63 = vld [vmem:[%s4265_s23] sm:$0xff]  ;;  %s5013_s1 = sld [smem:[#allocation12_spill]]  ;;  %s5015_s29 = sld [smem:[#allocation13_spill]] }
 0x10d   : > { %v1056_v35 = vsel %vm1049_vm2, %v1043_v32, 0.0  ;;  %v1065_v62 = vsel %vm1049_vm2, %v1046_v61, 0.0  ;;  %v1154_v0 = vld [vmem:[%s4265_s23 + $0x8] sm:$0xff]  ;;  %v1155_v2 = vld [vmem:[%s4265_s23 + $0x10] sm:$0xff]  ;;  %v1156_v3 = vld [vmem:[%s4265_s23 + $0x18] sm:$0xff]  ;;  %s5017_s28 = scalar_lea.vmem %s4967_s8, %s4247_s24  ;;  %s4103_s23 = smov 96  }
 0x10e   : > { %1057 = vadd.xlane.f32.xlu1 %v1056_v35  ;;  %v3799_v1 = vpack.c.bf16 %v1154_v0, %v1153_v63  ;;  %v3803_v4 = vpack.c.bf16 %v1156_v3, %v1155_v2  ;;  %vm4104_vm3 = vmmov 0   ;;  %s4106_s21 = smov 112   ;;  %vm1286_vm4 = vcmask 130048   ;;  %s4110_s6 = smov 48  }
 0x10f   : > { %vm4455_vm5 = vmpackc.low %vm1286_vm4, %vm1286_vm4  ;;  %vm1385_vm7 = vcmask 195584   ;;  %s4111_s2 = smov 16   ;;  %s5024_s25 = scalar_lea.vmem %s4977_s18, %s4247_s24 }
 0x110   : > { %3800 = vmatprep.subr.bf16.mxu1 %v3799_v1  ;;  %p3388_p5 = scmp.ne.s32.totalorder %s4241_s30, 1 }
 0x111   : > { %v1042_v33 = vld [vmem:[#allocation2 + $0x8] sm:$0xff]  ;;  %v1045_v57 = vld [vmem:[#allocation2 + $0x20] sm:$0xff]  ;;  %3802 = vmatpush3.bf16.msra.mxu1 %v3799_v1  ;;  %s5025_s4 = sld [smem:[#allocation18_spill]] (!%p3388_p5) }
 0x112   : > { %v1041_v31 = vld [vmem:[#allocation2] sm:$0xff]  ;;  %v1044_v36 = vld [vmem:[#allocation2 + $0x18] sm:$0xff]  ;;  %v1053_v37 = vsel %vm1049_vm2, %v1042_v33, 0.0  ;;  %v1062_v60 = vsel %vm1049_vm2, %v1045_v57, 0.0  ;;  %3804 = vmatprep.subr.bf16.mxu1 %v3803_v4  ;;  %s5014_s9 = scalar_lea.vmem %s5013_s1, %s4247_s24  ;;  %s5016_s3 = scalar_lea.vmem %s5015_s29, %s4247_s24 }
 0x113   : > { %v1050_v34 = vsel %vm1049_vm2, %v1041_v31, 0.0  ;;  %v1059_v38 = vsel %vm1049_vm2, %v1044_v36, 0.0  ;;  %v3322_v26 = vld [vmem:[%s5014_s9] ss:$0 sm:$0xff]  ;;  %s4107_s1 = smov 80   ;;  %s4109_s9 = smov 64  }
 0x114   : > { %1051 = vadd.xlane.f32.xlu0 %v1050_v34  ;;  %1060 = vadd.xlane.f32.xlu1 %v1059_v38  ;;  %v3323_v29 = vld [vmem:[%s5016_s3] ss:$0 sm:$0xff]  ;;  %s5020_s3 = scalar_lea.vmem %s4969_s10, %s4247_s24 }
 0x115   : > { %3806 = vmatpush3.bf16.msra.mxu1 %v3803_v4 }
 0x118   : > { %1054 = vadd.xlane.f32.xlu0 %v1053_v37 }
 0x19b   : > { %v1058_v40 = vpop.xlane.xlu1 %1057 }
 0x19c   : > { %v1071_v42 = vmul.f32 0.03125, %v1058_v40 }
 0x19e   : > { %v4373_v44 = vsub.f32 %v1043_v32, %v1071_v42 }
 0x1a0   : > { %v1083_v50 = vmul.f32 %v4373_v44, %v4373_v44 }
 0x1a1   : > { %v1052_v39 = vpop.xlane.xlu0 %1051  ;;  %v1061_v46 = vpop.xlane.xlu1 %1060 }
 0x1a2   : > { %v1069_v41 = vmul.f32 0.03125, %v1052_v39  ;;  %v1072_v48 = vmul.f32 0.03125, %v1061_v46  ;;  %v1093_v54 = vsel %vm1049_vm2, %v1083_v50, 0.0 }
 0x1a4   : > { %v4371_v43 = vsub.f32 %v1041_v31, %v1069_v41  ;;  %v4381_v52 = vsub.f32 %v1044_v36, %v1072_v48 }
 0x1a5   : > { %v1055_v45 = vpop.xlane.xlu0 %1054 }
 0x1a6   : > { %v1070_v47 = vmul.f32 0.03125, %v1055_v45  ;;  %v1081_v49 = vmul.f32 %v4371_v43, %v4371_v43  ;;  %v1084_v56 = vmul.f32 %v4381_v52, %v4381_v52 }
 0x1a8   : > { %v4379_v51 = vsub.f32 %v1042_v33, %v1070_v47  ;;  %v1087_v53 = vsel %vm1049_vm2, %v1081_v49, 0.0  ;;  %v1096_v59 = vsel %vm1049_vm2, %v1084_v56, 0.0 }
 0x1a9   : > { %1088 = vadd.xlane.f32.xlu0 %v1087_v53 }
 0x1aa   : > { %v1082_v55 = vmul.f32 %v4379_v51, %v4379_v51 }
 0x1ac   : > { %v1090_v58 = vsel %vm1049_vm2, %v1082_v55, 0.0 }
 0x1ad   : > { %1094 = vadd.xlane.f32.xlu0 %v1093_v54  ;;  %1091 = vadd.xlane.f32.xlu1 %v1090_v58 }
 0x1b1   : > { %1097 = vadd.xlane.f32.xlu1 %v1096_v59  ;;  %1063 = vadd.xlane.f32.xlu0 %v1062_v60  ;;  %v4102_v59 = vmov 0.0|0.0   ;;  %v4426_v60 = vld [vmem:[%s5017_s28] ss:$0 sm:$0xff]  ;;  %s5021_s28 = scalar_lea.vmem %s4970_s11, %s4247_s24 }
 0x1b2   : > { %3807 = vmatprep.subr.bf16.mxu1 %v4102_v59  ;;  %3811 = vmatprep.subr.bf16.mxu0 %v4102_v59 }
 0x1b5   : > { %1066 = vadd.xlane.f32.xlu1 %v1065_v62 }
 0x236   : > { %v1089_v5 = vpop.xlane.xlu0 %1088 }
 0x237   : > { %v1105_v6 = vmul.f32 0.03125, %v1089_v5  ;;  %v4105_v5 = vmov 0.0  }
 0x238   : > { %3582 = vmatprep.mubr.msk.f32.mxu0 %vm4104_vm3, %v4105_v5 }
 0x239   : > { %v1111_v7 = vadd.f32 1e-06, %v1105_v6 }
 0x23a   : > { %v1092_v8 = vpop.xlane.xlu1 %1091  ;;  %v1095_v9 = vpop.xlane.xlu0 %1094 }
 0x23b   : > { %3972 = vrsqrt.f32 %v1111_v7  ;;  %v1106_v10 = vmul.f32 0.03125, %v1092_v8  ;;  %v1107_v11 = vmul.f32 0.03125, %v1095_v9 }
 0x23d   : > { %v1112_v12 = vadd.f32 1e-06, %v1106_v10  ;;  %v1113_v13 = vadd.f32 1e-06, %v1107_v11 }
 0x23e   : > { %v1098_v14 = vpop.xlane.xlu1 %1097  ;;  %v1064_v15 = vpop.xlane.xlu0 %1063 }
 0x23f   : > { %3974 = vrsqrt.f32 %v1112_v12  ;;  %v1108_v16 = vmul.f32 0.03125, %v1098_v14  ;;  %v1073_v17 = vmul.f32 0.03125, %v1064_v15 }
 0x240   : > { %3976 = vrsqrt.f32 %v1113_v13 }
 0x241   : > { %v1114_v18 = vadd.f32 1e-06, %v1108_v16  ;;  %v1079_v19 = vsub.f32 %v1045_v57, %v1073_v17 }
 0x242   : > { %v1067_v20 = vpop.xlane.xlu1 %1066 }
 0x243   : > { %3978 = vrsqrt.f32 %v1114_v18  ;;  %v1074_v21 = vmul.f32 0.03125, %v1067_v20  ;;  %v1085_v22 = vmul.f32 %v1079_v19, %v1079_v19 }
 0x245   : > { %v3973_v23 = vpop.eup %3972  ;;  %v1080_v24 = vsub.f32 %v1046_v61, %v1074_v21  ;;  %v1099_v25 = vsel %vm1049_vm2, %v1085_v22, 0.0  ;;  %v1037_v22 = vlaneseq }
 0x246   : > { %1100 = vadd.xlane.f32.xlu0 %v1099_v25  ;;  %v1123_v27 = vmul.f32 %v3973_v23, %v4371_v43  ;;  %v4108_v25 = vmov -1e+30  }
 0x247   : > { %v1086_v28 = vmul.f32 %v1080_v24, %v1080_v24  ;;  %v1038_v23 = vand.u32 127, %v1037_v22 }
 0x248   : > { %v1135_v30 = vmul.f32 %v3322_v26, %v1123_v27 }
 0x249   : > { %v3975_v31 = vpop.eup %3974  ;;  %v1102_v32 = vsel %vm1049_vm2, %v1086_v28, 0.0  ;;  %vm1039_vm6 = vcmp.lt.s32.totalorder %v1038_v23, 17 }
 0x24a   : > { %v3977_v33 = vpop.eup %3976  ;;  %1103 = vadd.xlane.f32.xlu1 %v1102_v32  ;;  %v1147_v34 = vadd.f32 %v3323_v29, %v1135_v30  ;;  %v1124_v35 = vmul.f32 %v3975_v31, %v4379_v51 }
 0x24b   : > { %v1125_v36 = vmul.f32 %v3977_v33, %v4373_v44 }
 0x24c   : > { %3552 = vmatprep.mubr.msk.f32.mxu1 %vm1049_vm2, %v1147_v34  ;;  %v1136_v37 = vmul.f32 %v3322_v26, %v1124_v35 }
 0x24d   : > { %v3979_v38 = vpop.eup %3978  ;;  %v1137_v39 = vmul.f32 %v3322_v26, %v1125_v36 }
 0x24e   : > { %v1148_v40 = vadd.f32 %v3323_v29, %v1136_v37  ;;  %v1126_v41 = vmul.f32 %v3979_v38, %v4381_v52 }
 0x24f   : > { %v1149_v42 = vadd.f32 %v3323_v29, %v1137_v39 }
 0x250   : > { %3553 = vmatmul.mubr.msk.f32.vlgmr.msra.gmra.mrb[0].mxu1 %vm1049_vm2, %v1148_v40  ;;  %v1138_v43 = vmul.f32 %v3322_v26, %v1126_v41 }
 0x251   : > { %3555 = vmatprep.mubr.msk.f32.mxu1 %vm1049_vm2, %v1149_v42 }
 0x252   : > { %v1150_v45 = vadd.f32 %v3323_v29, %v1138_v43 }
 0x254   : > { %3556 = vmatmul.mubr.msk.f32.gmra.mrb[2].mxu1 %vm1049_vm2, %v1150_v45 }
 0x2d3   : > { %v1101_v46 = vpop.xlane.xlu0 %1100 }
 0x2d4   : > { %v1109_v47 = vmul.f32 0.03125, %v1101_v46 }
 0x2d6   : > { %v1115_v44 = vadd.f32 1e-06, %v1109_v47 }
 0x2d7   : > { %v1104_v48 = vpop.xlane.xlu1 %1103 }
 0x2d8   : > { %3980 = vrsqrt.f32 %v1115_v44  ;;  %v1110_v49 = vmul.f32 0.03125, %v1104_v48 }
 0x2da   : > { %v1116_v50 = vadd.f32 1e-06, %v1110_v49 }
 0x2dc   : > { %3982 = vrsqrt.f32 %v1116_v50 }
 0x2e2   : > { %v3981_v51 = vpop.eup %3980 }
 0x2e3   : > { %v1127_v52 = vmul.f32 %v3981_v51, %v1079_v19 }
 0x2e5   : > { %v1139_v53 = vmul.f32 %v3322_v26, %v1127_v52 }
 0x2e6   : > { %v3983_v54 = vpop.eup %3982 }
 0x2e7   : > { %v1151_v55 = vadd.f32 %v3323_v29, %v1139_v53  ;;  %v1128_v56 = vmul.f32 %v3983_v54, %v1080_v24 }
 0x2e9   : > { %3558 = vmatprep.mubr.msk.f32.mxu1 %vm1049_vm2, %v1151_v55  ;;  %v1140_v57 = vmul.f32 %v3322_v26, %v1128_v56  ;;  %v4492_v26 = vsel %vm1039_vm6, 0.0, %v4108_v25 }
 0x2eb   : > { %v1152_v58 = vadd.f32 %v3323_v29, %v1140_v57 }
 0x2ed   : > { %3559 = vmatmul.mubr.msk.f32.gmra.mrb[4].mxu1 %vm1049_vm2, %v1152_v58 }
 0x2ee   : > { %3567 = vmatprep.mubr.msk.f32.mxu1 %vm4104_vm3, %v4105_v5 }
 0x323   : > { %v3554_v61 = vpop.f32.mrb[0].mxu1 }
 0x324   : > { %v1254_v62 = vadd.f32 %v3554_v61, %v4426_v60  ;;  %v1248_v63 = vpop.f32.mrb[1].mxu1 }
 0x325   : > { %v1249_v0 = vadd.f32 %v4426_v60, %v1248_v63 }
 0x327   : > { %v4430_v1 = vpop.f32.mrb[2].mxu1  ;;  %v4432_v2 = vpack.i.bf16 %v1254_v62, %v1249_v0 }
 0x328   : > { %v1258_v3 = vpop.f32.mrb[3].mxu1 }
 0x329   : > { %v4435_v4 = vadd.f32 %v4426_v60, %v1258_v3  ;;  %3933 = vrot.lane.b32.xlu0 %v4432_v2, %s4103_s23 }
 0x32b   : > { %1284 = vrot.lane.b32.xlu1 %v4435_v4, %s4103_s23 }
 0x32d   : > { %1517 = vrot.lane.b32.xlu0 %v1249_v0, %s4106_s21 }
 0x32f   : > { %3938 = vrot.lane.b32.xlu1 %v4432_v2, %s4107_s1 }
 0x331   : > { %1521 = vrot.lane.b32.xlu0 %v4435_v4, %s4106_s21 }
 0x333   : > { %1527 = vrot.lane.b32.xlu1 %v4435_v4, %s4107_s1 }
 0x337   : > { %1519 = vrot.lane.b32.xlu1 %v1254_v62, %s4106_s21 }
 0x39b   : > { %v3934_v6 = vpop.permute.xlu0 %3933 }
 0x39c   : > { %v3936_v7 = vunpack.i.h.bf16 %v3934_v6  ;;  %v3935_v8 = vunpack.i.l.bf16 %v3934_v6 }
 0x39d   : > { %v1285_v9 = vpop.permute.xlu1 %1284 }
 0x39e   : > { %v3808_v11 = vpack.c.bf16 %v3936_v7, %v3935_v8 }
 0x39f   : > { %v1518_v17 = vpop.permute.xlu0 %1517 }
 0x3a0   : > { %3810 = vmatpush3.bf16.xpose.msk.msra.mxu1 %vm4455_vm5, %v3808_v11 }
 0x3a1   : > { %3565 = vmatprep.subr.mxu1 %v4105_v5  ;;  %v3939_v12 = vpop.permute.xlu1 %3938 }
 0x3a2   : > { %v3941_v13 = vunpack.i.h.bf16 %v3939_v12  ;;  %v3940_v14 = vunpack.i.l.bf16 %v3939_v12 }
 0x3a3   : > { %v1522_v19 = vpop.permute.xlu0 %1521 }
 0x3a4   : > { %v3815_v15 = vpack.c.bf16 %v3941_v13, %v3940_v14 }
 0x3a5   : > { %v1528_v16 = vpop.permute.xlu1 %1527 }
 0x3a8   : > { %3566 = vmatpush3.xpose.msk.msra.mxu1 %vm1286_vm4, %v1285_v9 }
 0x3a9   : > { %3814 = vmatprep.subr.bf16.mxu1 %v4102_v59  ;;  %v1520_v18 = vpop.permute.xlu1 %1519 }
 0x3ab   : > { %3568 = vmatmul.mubr.msk.f32.vlgmr.msra.gmra.mrb[6].mxu1 %vm1286_vm4, %v1249_v0 }
 0x3ac   : > { %3817 = vmatpush3.bf16.xpose.msk.msra.mxu1 %vm4455_vm5, %v3815_v15  ;;  %3570 = vmatprep.mubr.msk.f32.mxu1 %vm4104_vm3, %v4105_v5 }
 0x3ad   : > { %3595 = vmatprep.subr.mxu1 %v4105_v5 }
 0x3af   : > { %3571 = vmatmul.mubr.msk.f32.gmra.mrb[8].mxu1 %vm1286_vm4, %v1254_v62 }
 0x3b0   : > { %3573 = vmatprep.mubr.msk.f32.mxu1 %vm4104_vm3, %v4105_v5 }
 0x3b3   : > { %3574 = vmatmul.mubr.msk.f32.gmra.mrb[10].mxu1 %vm1286_vm4, %v4435_v4 }
 0x3b4   : > { %3596 = vmatpush3.xpose.msk.msra.mxu1 %vm1286_vm4, %v1528_v16  ;;  %3597 = vmatprep.mubr.msk.f32.mxu1 %vm4104_vm3, %v4105_v5 }
 0x3b5   : > { %3821 = vmatprep.subr.bf16.mxu1 %v4102_v59 }
 0x3b7   : > { %3598 = vmatmul.mubr.msk.f32.vlgmr.msra.gmra.mrb[12].mxu1 %vm1286_vm4, %v1518_v17 }
 0x3b8   : > { %3600 = vmatprep.mubr.msk.f32.mxu1 %vm4104_vm3, %v4105_v5 }
 0x3bb   : > { %3601 = vmatmul.mubr.msk.f32.gmra.mrb[14].mxu1 %vm1286_vm4, %v1520_v18 }
 0x3bc   : > { %3603 = vmatprep.mubr.msk.f32.mxu1 %vm4104_vm3, %v4105_v5 }
 0x3bf   : > { %3604 = vmatmul.mubr.msk.f32.gmra.mrb[16].mxu1 %vm1286_vm4, %v1522_v19 }
 0x3c0   : > { %v4486_v20 = vpop.f32.mrb[4].mxu1  ;;  %3629 = vmatprep.mubr.msk.f32.mxu1 %vm4104_vm3, %v4105_v5 }
 0x3c1   : > { %v4490_v21 = vpop.f32.mrb[5].mxu1 }
 0x47e   : > { %v1365_v24 = vpop.f32.mrb[6].mxu1 }
 0x47f   : > { %v1379_v27 = vmul.f32 0.25, %v1365_v24  ;;  %v3569_v28 = vpop.f32.mrb[7].mxu1 }
 0x480   : > { %v4529_v28 = vadd.f32 %v4426_v60, %v4490_v21 }
 0x481   : > { %v1382_v29 = vadd.f32 %v1379_v27, %v4492_v26 }
 0x482   : > { %v1370_v30 = vpop.f32.mrb[8].mxu1 }
 0x483   : > { %v1380_v31 = vmul.f32 0.25, %v1370_v30  ;;  %v3572_v32 = vpop.f32.mrb[9].mxu1  ;;  %v1386_v33 = vsel %vm1385_vm7, %v1382_v29, -inf }
 0x484   : > { %1387 = vmax.xlane.f32.xlu1 %v1386_v33 }
 0x485   : > { %v1383_v34 = vadd.f32 %v1380_v31, %v4492_v26  ;;  %v4545_v31 = vadd.f32 %v4486_v20, %v4426_v60 }
 0x486   : > { %v1375_v35 = vpop.f32.mrb[10].mxu1 }
 0x487   : > { %v1381_v36 = vmul.f32 0.25, %v1375_v35  ;;  %v3575_v37 = vpop.f32.mrb[11].mxu1  ;;  %v1389_v38 = vsel %vm1385_vm7, %v1383_v34, -inf }
 0x488   : > { %1390 = vmax.xlane.f32.xlu0 %v1389_v38 }
 0x489   : > { %v1384_v39 = vadd.f32 %v1381_v36, %v4492_v26 }
 0x48a   : > { %v1607_v40 = vpop.f32.mrb[12].mxu1 }
 0x48b   : > { %v1621_v41 = vmul.f32 0.25, %v1607_v40  ;;  %v3599_v42 = vpop.f32.mrb[13].mxu1  ;;  %v1392_v43 = vsel %vm1385_vm7, %v1384_v39, -inf }
 0x48c   : > { %1393 = vmax.xlane.f32.xlu0 %v1392_v43 }
 0x48d   : > { %v1624_v45 = vadd.f32 %v1621_v41, %v4492_v26 }
 0x48e   : > { %v1612_v46 = vpop.f32.mrb[14].mxu1 }
 0x48f   : > { %v1622_v47 = vmul.f32 0.25, %v1612_v46  ;;  %v3602_v44 = vpop.f32.mrb[15].mxu1  ;;  %v1627_v48 = vsel %vm1385_vm7, %v1624_v45, -inf }
 0x490   : > { %1628 = vmax.xlane.f32.xlu0 %v1627_v48 }
 0x491   : > { %v1625_v49 = vadd.f32 %v1622_v47, %v4492_v26 }
 0x492   : > { %v1617_v50 = vpop.f32.mrb[16].mxu1 }
 0x493   : > { %v1623_v51 = vmul.f32 0.25, %v1617_v50  ;;  %v3605_v52 = vpop.f32.mrb[17].mxu1  ;;  %v1630_v53 = vsel %vm1385_vm7, %v1625_v49, -inf }
 0x494   : > { %1631 = vmax.xlane.f32.xlu1 %v1630_v53 }
 0x495   : > { %v1626_v54 = vadd.f32 %v1623_v51, %v4492_v26 }
 0x497   : > { %v1633_v55 = vsel %vm1385_vm7, %v1626_v54, -inf }
 0x498   : > { %1634 = vmax.xlane.f32.xlu0 %v1633_v55 }
 0x4a5   : > { %1423 = vrot.lane.b32.xlu1 %v4435_v4, %s4109_s9 }
 0x4a9   : > { %3948 = vrot.lane.b32.xlu1 %v4432_v2, %s4110_s6 }
 0x4ae   : > { %3943 = vrot.lane.b32.xlu0 %v4432_v2, %s4109_s9 }
 0x511   : > { %v1388_v56 = vpop.xlane.xlu1 %1387 }
 0x512   : > { %v1395_v57 = vsub.f32 %v1382_v29, %v1388_v56  ;;  %v4533_v29 = vadd.f32 %v4430_v1, %v4426_v60 }
 0x514   : > { %v1398_v58 = vmul.f32 1.442695, %v1395_v57  ;;  %v4537_v30 = vpack.i.bf16 %v4529_v28, %v4533_v29 }
 0x515   : > { %v1391_v61 = vpop.xlane.xlu0 %1390 }
 0x516   : > { %3984 = vpow2.f32 %v1398_v58  ;;  %v1396_v62 = vsub.f32 %v1383_v34, %v1391_v61 }
 0x518   : > { %v1400_v63 = vmul.f32 1.442695, %v1396_v62 }
 0x519   : > { %v1394_v0 = vpop.xlane.xlu0 %1393 }
 0x51a   : > { %3986 = vpow2.f32 %v1400_v63  ;;  %v1397_v3 = vsub.f32 %v1384_v39, %v1394_v0 }
 0x51c   : > { %v1402_v6 = vmul.f32 1.442695, %v1397_v3 }
 0x51d   : > { %v1629_v7 = vpop.xlane.xlu0 %1628 }
 0x51e   : > { %3988 = vpow2.f32 %v1402_v6  ;;  %v1636_v8 = vsub.f32 %v1624_v45, %v1629_v7 }
 0x520   : > { %v3985_v9 = vpop.eup %3984  ;;  %v1639_v11 = vmul.f32 1.442695, %v1636_v8 }
 0x521   : > { %v1404_v12 = vsel %vm1385_vm7, %v3985_v9, 0.0  ;;  %v1632_v22 = vpop.xlane.xlu1 %1631 }
 0x522   : > { %3990 = vpow2.f32 %v1639_v11  ;;  %1405 = vadd.xlane.f32.xlu1 %v1404_v12  ;;  %v1637_v21 = vsub.f32 %v1625_v49, %v1632_v22 }
 0x524   : > { %v4513_v2 = vpop.eup %3986  ;;  %v1641_v1 = vmul.f32 1.442695, %v1637_v21 }
 0x525   : > { %v1635_v13 = vpop.xlane.xlu0 %1634  ;;  %v1407_v14 = vsel %vm1385_vm7, %v4513_v2, 0.0  ;;  %v1424_v27 = vpop.permute.xlu1 %1423 }
 0x526   : > { %1408 = vadd.xlane.f32.xlu0 %v1407_v14  ;;  %v1638_v32 = vsub.f32 %v1626_v54, %v1635_v13  ;;  %3992 = vpow2.f32 %v1641_v1 }
 0x528   : > { %v4517_v15 = vpop.eup %3988  ;;  %v1643_v33 = vmul.f32 1.442695, %v1638_v32 }
 0x529   : > { %v3944_v16 = vpop.permute.xlu0 %3943  ;;  %v1410_v17 = vsel %vm1385_vm7, %v4517_v15, 0.0  ;;  %v3949_v35 = vpop.permute.xlu1 %3948 }
 0x52a   : > { %v3946_v18 = vunpack.i.h.bf16 %v3944_v16  ;;  %v3945_v19 = vunpack.i.l.bf16 %v3944_v16  ;;  %1411 = vadd.xlane.f32.xlu1 %v1410_v17  ;;  %3994 = vpow2.f32 %v1643_v33  ;;  %v3951_v39 = vunpack.i.h.bf16 %v3949_v35 }
 0x52b   : > { %v3950_v40 = vunpack.i.l.bf16 %v3949_v35 }
 0x52c   : > { %v4521_v23 = vpop.eup %3990  ;;  %v3812_v24 = vpack.c.bf16 %v3946_v18, %v3945_v19 }
 0x52d   : > { %v1645_v25 = vsel %vm1385_vm7, %v4521_v23, 0.0  ;;  %v3819_v45 = vpack.c.bf16 %v3951_v39, %v3950_v40 }
 0x52e   : > { %1646 = vadd.xlane.f32.xlu0 %v1645_v25  ;;  %3813 = vmatpush3.bf16.msra.mxu0 %v3812_v24 }
 0x52f   : > { %3580 = vmatprep.subr.mxu0 %v4105_v5 }
 0x532   : > { %3581 = vmatpush3.msra.mxu0 %v1424_v27 }
 0x533   : > { %3818 = vmatprep.subr.bf16.mxu0 %v4102_v59 }
 0x53b   : > { %3953 = vrot.lane.b32.xlu1 %v4537_v30, %s4103_s23 }
 0x544   : > { %1664 = vrot.lane.b32.xlu0 %v4435_v4, %s4110_s6  ;;  %v3993_v4 = vpop.eup %3992 }
 0x545   : > { %v1648_v34 = vsel %vm1385_vm7, %v3993_v4, 0.0  ;;  %v3995_v60 = vpop.eup %3994 }
 0x546   : > { %v1651_v20 = vsel %vm1385_vm7, %v3995_v60, 0.0 }
 0x548   : > { %1899 = vrot.lane.b32.xlu0 %v4545_v31, %s4103_s23 }
 0x54c   : > { %2140 = vrot.lane.b32.xlu0 %v4545_v31, %s4107_s1 }
 0x550   : > { %2132 = vrot.lane.b32.xlu0 %v4529_v28, %s4106_s21 }
 0x55f   : > { %1649 = vadd.xlane.f32.xlu1 %v1648_v34 }
 0x563   : > { %1652 = vadd.xlane.f32.xlu1 %v1651_v20 }
 0x574   : > { %3958 = vrot.lane.b32.xlu1 %v4537_v30, %s4107_s1 }
 0x578   : > { %2130 = vrot.lane.b32.xlu1 %v4533_v29, %s4106_s21 }
 0x57c   : > { %2134 = vrot.lane.b32.xlu1 %v4545_v31, %s4106_s21  ;;  %s5022_s21 = scalar_lea.vmem %s4971_s12, %s4247_s24 }
 0x5af   : > { %v1406_v36 = vpop.xlane.xlu1 %1405 }
 0x5b0   : > { %3996 = vrcp.f32 %v1406_v36 }
 0x5b3   : > { %v1409_v37 = vpop.xlane.xlu0 %1408 }
 0x5b4   : > { %3998 = vrcp.f32 %v1409_v37 }
 0x5b7   : > { %v1412_v38 = vpop.xlane.xlu1 %1411 }
 0x5b8   : > { %4000 = vrcp.f32 %v1412_v38 }
 0x5ba   : > { %v3997_v41 = vpop.eup %3996 }
 0x5bb   : > { %v1647_v42 = vpop.xlane.xlu0 %1646  ;;  %v1416_v43 = vmul.f32 %v3997_v41, %v3985_v9  ;;  %v3954_v48 = vpop.permute.xlu1 %3953 }
 0x5bc   : > { %4002 = vrcp.f32 %v1647_v42  ;;  %v3956_v51 = vunpack.i.h.bf16 %v3954_v48  ;;  %v3955_v52 = vunpack.i.l.bf16 %v3954_v48 }
 0x5bd   : > { %3583 = vmatmul.mubr.msk.f32.vlgmr.msra.gmra.mrb[0].mxu0 %vm1385_vm7, %v1416_v43 }
 0x5be   : > { %v3999_v46 = vpop.eup %3998  ;;  %3820 = vmatpush3.bf16.msra.mxu0 %v3819_v45  ;;  %3585 = vmatprep.mubr.msk.f32.mxu0 %vm4104_vm3, %v4105_v5  ;;  %v3828_v55 = vpack.c.bf16 %v3956_v51, %v3955_v52 }
 0x5bf   : > { %v1665_v47 = vpop.permute.xlu0 %1664  ;;  %3610 = vmatprep.subr.mxu0 %v4105_v5  ;;  %v1417_v44 = vmul.f32 %v3999_v46, %v4513_v2 }
 0x5c1   : > { %3586 = vmatmul.mubr.msk.f32.gmra.mrb[2].mxu0 %vm1385_vm7, %v1417_v44 }
 0x5c2   : > { %v4001_v49 = vpop.eup %4000  ;;  %3611 = vmatpush3.msra.mxu0 %v1665_v47  ;;  %3588 = vmatprep.mubr.msk.f32.mxu0 %vm4104_vm3, %v4105_v5 }
 0x5c3   : > { %v1418_v50 = vmul.f32 %v4001_v49, %v4517_v15  ;;  %3827 = vmatprep.subr.bf16.mxu0 %v4102_v59  ;;  %v1900_v56 = vpop.permute.xlu0 %1899 }
 0x5c5   : > { %3589 = vmatmul.mubr.msk.f32.gmra.mrb[4].mxu0 %vm1385_vm7, %v1418_v50 }
 0x5c6   : > { %v4003_v53 = vpop.eup %4002  ;;  %3612 = vmatprep.mubr.msk.f32.mxu0 %vm4104_vm3, %v4105_v5 }
 0x5c7   : > { %v1657_v54 = vmul.f32 %v4003_v53, %v4521_v23  ;;  %v2141_v9 = vpop.permute.xlu0 %2140 }
 0x5c9   : > { %3613 = vmatmul.mubr.msk.f32.vlgmr.msra.gmra.mrb[6].mxu0 %vm1385_vm7, %v1657_v54 }
 0x5ca   : > { %3830 = vmatpush3.bf16.xpose.msk.msra.mxu0 %vm4455_vm5, %v3828_v55  ;;  %3615 = vmatprep.mubr.msk.f32.mxu0 %vm4104_vm3, %v4105_v5 }
 0x5cb   : > { %3642 = vmatprep.subr.mxu0 %v4105_v5  ;;  %v2133_v11 = vpop.permute.xlu0 %2132 }
 0x5d2   : > { %3643 = vmatpush3.xpose.msk.msra.mxu0 %vm1286_vm4, %v1900_v56 }
 0x5d3   : > { %3834 = vmatprep.subr.bf16.mxu0 %v4102_v59 }
 0x5ec   : > { %v1650_v57 = vpop.xlane.xlu1 %1649 }
 0x5ed   : > { %4004 = vrcp.f32 %v1650_v57 }
 0x5f0   : > { %v1653_v58 = vpop.xlane.xlu1 %1652 }
 0x5f1   : > { %4006 = vrcp.f32 %v1653_v58 }
 0x5f4   : > { %v3959_v63 = vpop.permute.xlu1 %3958 }
 0x5f5   : > { %v3961_v6 = vunpack.i.h.bf16 %v3959_v63  ;;  %v3960_v7 = vunpack.i.l.bf16 %v3959_v63 }
 0x5f7   : > { %v4005_v61 = vpop.eup %4004  ;;  %v3835_v8 = vpack.c.bf16 %v3961_v6, %v3960_v7 }
 0x5f8   : > { %v1658_v62 = vmul.f32 %v4005_v61, %v3993_v4  ;;  %v2131_v10 = vpop.permute.xlu1 %2130 }
 0x5fa   : > { %3616 = vmatmul.mubr.msk.f32.gmra.mrb[8].mxu0 %vm1385_vm7, %v1658_v62 }
 0x5fb   : > { %v4007_v0 = vpop.eup %4006  ;;  %3618 = vmatprep.mubr.msk.f32.mxu0 %vm4104_vm3, %v4105_v5 }
 0x5fc   : > { %v1659_v3 = vmul.f32 %v4007_v0, %v3995_v60  ;;  %v2135_v12 = vpop.permute.xlu1 %2134 }
 0x5fe   : > { %3619 = vmatmul.mubr.msk.f32.gmra.mrb[10].mxu0 %vm1385_vm7, %v1659_v3 }
 0x5ff   : > { %3644 = vmatprep.mubr.msk.f32.mxu0 %vm4104_vm3, %v4105_v5 }
 0x602   : > { %3645 = vmatmul.mubr.msk.f32.vlgmr.msra.gmra.mrb[12].mxu0 %vm1286_vm4, %v4533_v29 }
 0x603   : > { %3837 = vmatpush3.bf16.xpose.msk.msra.mxu0 %vm4455_vm5, %v3835_v8  ;;  %3647 = vmatprep.mubr.msk.f32.mxu0 %vm4104_vm3, %v4105_v5 }
 0x604   : > { %3672 = vmatprep.subr.mxu0 %v4105_v5 }
 0x606   : > { %3648 = vmatmul.mubr.msk.f32.gmra.mrb[14].mxu0 %vm1286_vm4, %v4529_v28 }
 0x607   : > { %3650 = vmatprep.mubr.msk.f32.mxu0 %vm4104_vm3, %v4105_v5 }
 0x60a   : > { %3651 = vmatmul.mubr.msk.f32.gmra.mrb[16].mxu0 %vm1286_vm4, %v4545_v31 }
 0x60b   : > { %3673 = vmatpush3.xpose.msk.msra.mxu0 %vm1286_vm4, %v2141_v9  ;;  %3674 = vmatprep.mubr.msk.f32.mxu0 %vm4104_vm3, %v4105_v5 }
 0x60c   : > { %3841 = vmatprep.subr.bf16.mxu0 %v4102_v59 }
 0x60e   : > { %3675 = vmatmul.mubr.msk.f32.vlgmr.msra.gmra.mrb[18].mxu0 %vm1286_vm4, %v2131_v10  ;;  %v1773_v10 = vld [vmem:[%s4270_s19] sm:$0xff] }
 0x60f   : > { %3677 = vmatprep.mubr.msk.f32.mxu0 %vm4104_vm3, %v4105_v5 }
 0x612   : > { %3678 = vmatmul.mubr.msk.f32.gmra.mrb[20].mxu0 %vm1286_vm4, %v2133_v11  ;;  %v1774_v11 = vld [vmem:[%s4270_s19 + $0x8] sm:$0xff] }
 0x613   : > { %3680 = vmatprep.mubr.msk.f32.mxu0 %vm4104_vm3, %v4105_v5 }
 0x616   : > { %3681 = vmatmul.mubr.msk.f32.gmra.mrb[22].mxu0 %vm1286_vm4, %v2135_v12  ;;  %v3822_v12 = vpack.c.bf16 %v1774_v11, %v1773_v10 }
 0x617   : > { %3706 = vmatprep.mubr.msk.f32.mxu0 %vm4104_vm3, %v4105_v5 }
 0x618   : > { %3823 = vmatpush3.bf16.msra.mxu1 %v3822_v12  ;;  %3843 = vmatpush3.bf16.msra.mxu0 %v3822_v12 }
 0x619   : > { %3824 = vmatprep.subr.bf16.mxu1 %v4102_v59  ;;  %3844 = vmatprep.subr.bf16.mxu0 %v4102_v59 }
 0x690   : > { %v4615_v2 = vpop.f32.mrb[0].mxu0 }
 0x691   : > { %v3584_v13 = vpop.f32.mrb[1].mxu0 }
 0x692   : > { %v1775_v13 = vld [vmem:[%s4270_s19 + $0x10] sm:$0xff] }
 0x694   : > { %v4617_v14 = vpop.f32.mrb[2].mxu0 }
 0x695   : > { %v3587_v15 = vpop.f32.mrb[3].mxu0 }
 0x696   : > { %v1776_v15 = vld [vmem:[%s4270_s19 + $0x18] sm:$0xff] }
 0x698   : > { %v4619_v16 = vpop.f32.mrb[4].mxu0 }
 0x699   : > { %v3590_v17 = vpop.f32.mrb[5].mxu0 }
 0x69a   : > { %v3825_v17 = vpack.c.bf16 %v1776_v15, %v1775_v13  ;;  %v1874_v13 = vld [vmem:[#allocation2 + $0x8] sm:$0xff] }
 0x69c   : > { %v4621_v18 = vpop.f32.mrb[6].mxu0  ;;  %3826 = vmatpush3.bf16.msra.mxu1 %v3825_v17  ;;  %3846 = vmatpush3.bf16.msra.mxu0 %v3825_v17 }
 0x69d   : > { %v3614_v19 = vpop.f32.mrb[7].mxu0  ;;  %3831 = vmatprep.subr.bf16.mxu1 %v4102_v59 }
 0x6cd   : > { %v4623_v22 = vpop.f32.mrb[8].mxu0 }
 0x6ce   : > { %v3617_v23 = vpop.f32.mrb[9].mxu0 }
 0x6d1   : > { %v4625_v24 = vpop.f32.mrb[10].mxu0 }
 0x6d2   : > { %v3620_v25 = vpop.f32.mrb[11].mxu0 }
 0x6d5   : > { %v1979_v27 = vpop.f32.mrb[12].mxu0 }
 0x6d6   : > { %v1993_v28 = vmul.f32 0.25, %v1979_v27  ;;  %v3646_v29 = vpop.f32.mrb[13].mxu0 }
 0x6d8   : > { %v1996_v21 = vadd.f32 %v1993_v28, %v4492_v26 }
 0x6d9   : > { %v1984_v1 = vpop.f32.mrb[14].mxu0 }
 0x6da   : > { %v1994_v32 = vmul.f32 0.25, %v1984_v1  ;;  %v3649_v33 = vpop.f32.mrb[15].mxu0  ;;  %v1999_v4 = vsel %vm1385_vm7, %v1996_v21, -inf }
 0x6db   : > { %2000 = vmax.xlane.f32.xlu0 %v1999_v4 }
 0x6dc   : > { %v1997_v34 = vadd.f32 %v1994_v32, %v4492_v26 }
 0x6dd   : > { %v1989_v60 = vpop.f32.mrb[16].mxu0 }
 0x6de   : > { %v1995_v20 = vmul.f32 0.25, %v1989_v60  ;;  %v3652_v35 = vpop.f32.mrb[17].mxu0  ;;  %v2002_v36 = vsel %vm1385_vm7, %v1997_v34, -inf }
 0x6df   : > { %2003 = vmax.xlane.f32.xlu1 %v2002_v36 }
 0x6e0   : > { %v1998_v37 = vadd.f32 %v1995_v20, %v4492_v26 }
 0x6e1   : > { %v2220_v38 = vpop.f32.mrb[18].mxu0 }
 0x6e2   : > { %v2234_v39 = vmul.f32 0.25, %v2220_v38  ;;  %v3676_v40 = vpop.f32.mrb[19].mxu0  ;;  %v2005_v41 = vsel %vm1385_vm7, %v1998_v37, -inf }
 0x6e3   : > { %2006 = vmax.xlane.f32.xlu0 %v2005_v41 }
 0x6e4   : > { %v2237_v42 = vadd.f32 %v2234_v39, %v4492_v26 }
 0x6e5   : > { %v2225_v43 = vpop.f32.mrb[20].mxu0 }
 0x6e6   : > { %v2235_v45 = vmul.f32 0.25, %v2225_v43  ;;  %v3679_v46 = vpop.f32.mrb[21].mxu0  ;;  %v2240_v47 = vsel %vm1385_vm7, %v2237_v42, -inf }
 0x6e7   : > { %2241 = vmax.xlane.f32.xlu0 %v2240_v47 }
 0x6e8   : > { %v2238_v44 = vadd.f32 %v2235_v45, %v4492_v26 }
 0x6e9   : > { %v2230_v48 = vpop.f32.mrb[22].mxu0 }
 0x6ea   : > { %v2236_v49 = vmul.f32 0.25, %v2230_v48  ;;  %v3682_v50 = vpop.f32.mrb[23].mxu0  ;;  %v2243_v51 = vsel %vm1385_vm7, %v2238_v44, -inf }
 0x6eb   : > { %2244 = vmax.xlane.f32.xlu0 %v2243_v51 }
 0x6ec   : > { %v2239_v52 = vadd.f32 %v2236_v49, %v4492_v26 }
 0x6ee   : > { %v2246_v53 = vsel %vm1385_vm7, %v2239_v52, -inf }
 0x6ef   : > { %2247 = vmax.xlane.f32.xlu1 %v2246_v53 }
 0x768   : > { %v2001_v54 = vpop.xlane.xlu0 %2000 }
 0x769   : > { %v2008_v55 = vsub.f32 %v1996_v21, %v2001_v54 }
 0x76b   : > { %v2011_v56 = vmul.f32 1.442695, %v2008_v55 }
 0x76c   : > { %v2004_v57 = vpop.xlane.xlu1 %2003 }
 0x76d   : > { %4008 = vpow2.f32 %v2011_v56  ;;  %v2009_v58 = vsub.f32 %v1997_v34, %v2004_v57 }
 0x76f   : > { %v2013_v61 = vmul.f32 1.442695, %v2009_v58 }
 0x770   : > { %v2007_v62 = vpop.xlane.xlu0 %2006 }
 0x771   : > { %4010 = vpow2.f32 %v2013_v61  ;;  %v2010_v63 = vsub.f32 %v1998_v37, %v2007_v62 }
 0x773   : > { %v2015_v0 = vmul.f32 1.442695, %v2010_v63  ;;  %v4729_v63 = vld [vmem:[%s5020_s3] ss:$0 sm:$0xff]  ;;  %s5028_s3 = sld [smem:[#allocation17_spill]] (!%p3388_p5) }
 0x774   : > { %v2242_v19 = vpop.xlane.xlu0 %2241 }
 0x775   : > { %4012 = vpow2.f32 %v2015_v0  ;;  %v2249_v23 = vsub.f32 %v2237_v42, %v2242_v19 }
 0x777   : > { %v4639_v3 = vpop.eup %4008  ;;  %v2252_v28 = vmul.f32 1.442695, %v2249_v23 }
 0x778   : > { %v2017_v26 = vsel %vm1385_vm7, %v4639_v3, 0.0  ;;  %v2245_v27 = vpop.xlane.xlu0 %2244 }
 0x779   : > { %2018 = vadd.xlane.f32.xlu0 %v2017_v26  ;;  %v2250_v29 = vsub.f32 %v2238_v44, %v2245_v27  ;;  %4014 = vpow2.f32 %v2252_v28  ;;  %v1875_v28 = vld [vmem:[#allocation2 + $0x10] sm:$0xff] }
 0x77b   : > { %v4643_v6 = vpop.eup %4010  ;;  %v2254_v1 = vmul.f32 1.442695, %v2250_v29 }
 0x77c   : > { %v2020_v7 = vsel %vm1385_vm7, %v4643_v6, 0.0 }
 0x77d   : > { %2021 = vadd.xlane.f32.xlu1 %v2020_v7  ;;  %v1873_v7 = vld [vmem:[#allocation2] sm:$0xff] }
 0x77f   : > { %v4647_v8 = vpop.eup %4012 }
 0x780   : > { %v2023_v9 = vsel %vm1385_vm7, %v4647_v8, 0.0 }
 0x781   : > { %2024 = vadd.xlane.f32.xlu0 %v2023_v9 }
 0x783   : > { %v4664_v32 = vpop.eup %4014 }
 0x784   : > { %v2258_v4 = vsel %vm1385_vm7, %v4664_v32, 0.0 }
 0x78e   : > { %1763 = vrot.lane.b32.xlu1 %v4623_v22, %s4111_s2  ;;  %v2248_v22 = vpop.xlane.xlu1 %2247 }
 0x78f   : > { %v2251_v25 = vsub.f32 %v2239_v52, %v2248_v22 }
 0x791   : > { %v2256_v21 = vmul.f32 1.442695, %v2251_v25 }
 0x792   : > { %3963 = vrot.lane.b32.xlu1 %v4537_v30, %s4109_s9 }
 0x793   : > { %4016 = vpow2.f32 %v2256_v21 }
 0x794   : > { %4018 = vpow2.f32 %v2254_v1 }
 0x797   : > { %1761 = vrot.lane.b32.xlu0 %v4621_v18, %s4111_s2 }
 0x79d   : > { %v4666_v33 = vpop.eup %4016 }
 0x79e   : > { %v2264_v18 = vsel %vm1385_vm7, %v4666_v33, 0.0  ;;  %v4672_v34 = vpop.eup %4018 }
 0x79f   : > { %v2261_v60 = vsel %vm1385_vm7, %v4672_v34, 0.0 }
 0x7b6   : > { %2259 = vadd.xlane.f32.xlu1 %v2258_v4  ;;  %2265 = vadd.xlane.f32.xlu0 %v2264_v18 }
 0x7ba   : > { %2262 = vadd.xlane.f32.xlu1 %v2261_v60 }
 0x7cb   : > { %1765 = vrot.lane.b32.xlu1 %v4625_v24, %s4111_s2 }
 0x7cf   : > { %2036 = vrot.lane.b32.xlu1 %v4545_v31, %s4109_s9 }
 0x7d3   : > { %3968 = vrot.lane.b32.xlu1 %v4537_v30, %s4110_s6 }
 0x7d7   : > { %2277 = vrot.lane.b32.xlu1 %v4545_v31, %s4110_s6  ;;  %s5023_s6 = scalar_lea.vmem %s4974_s15, %s4247_s24 }
 0x806   : > { %v2019_v20 = vpop.xlane.xlu0 %2018 }
 0x807   : > { %4020 = vrcp.f32 %v2019_v20 }
 0x80a   : > { %v2022_v35 = vpop.xlane.xlu1 %2021 }
 0x80b   : > { %4022 = vrcp.f32 %v2022_v35 }
 0x80e   : > { %v2025_v36 = vpop.xlane.xlu0 %2024  ;;  %v1764_v37 = vpop.permute.xlu1 %1763 }
 0x80f   : > { %v1771_v30 = vsel %vm1286_vm4, %v4617_v14, %v1764_v37  ;;  %4024 = vrcp.f32 %v2025_v36 }
 0x811   : > { %v4021_v45 = vpop.eup %4020 }
 0x812   : > { %v1762_v38 = vpop.permute.xlu0 %1761  ;;  %v3964_v39 = vpop.permute.xlu1 %3963  ;;  %v2029_v14 = vmul.f32 %v4021_v45, %v4639_v3  ;;  %v4736_v3 = vld [vmem:[%s5021_s28] ss:$0 sm:$0xff]  ;;  %s5026_s28 = smov (!%p3388_p5), %s5025_s4 }
 0x813   : > { %v1770_v40 = vsel %vm1286_vm4, %v4615_v2, %v1762_v38  ;;  %v3966_v41 = vunpack.i.h.bf16 %v3964_v39  ;;  %v3965_v24 = vunpack.i.l.bf16 %v3964_v39 }
 0x814   : > { %3630 = vmatmul.mubr.msk.f32.vlgmr.msra.gmra.mrb[18].mxu1 %vm1049_vm2, %v1770_v40 }
 0x815   : > { %v3832_v42 = vpack.c.bf16 %v3966_v41, %v3965_v24  ;;  %3632 = vmatprep.mubr.msk.f32.mxu1 %vm4104_vm3, %v4105_v5  ;;  %v4023_v44 = vpop.eup %4022 }
 0x816   : > { %v2030_v49 = vmul.f32 %v4023_v44, %v4643_v6  ;;  %v2486_v44 = vld [vmem:[#allocation2 + $0x18] sm:$0xff] }
 0x817   : > { %3833 = vmatpush3.bf16.msra.mxu1 %v3832_v42 }
 0x818   : > { %3633 = vmatmul.mubr.msk.f32.gmra.mrb[20].mxu1 %vm1049_vm2, %v1771_v30  ;;  %3657 = vmatprep.subr.mxu1 %v4105_v5 }
 0x819   : > { %3635 = vmatprep.mubr.msk.f32.mxu1 %vm4104_vm3, %v4105_v5  ;;  %v4025_v50 = vpop.eup %4024 }
 0x843   : > { %v2260_v31 = vpop.xlane.xlu1 %2259 }
 0x844   : > { %4026 = vrcp.f32 %v2260_v31 }
 0x847   : > { %v2263_v2 = vpop.xlane.xlu1 %2262 }
 0x848   : > { %4028 = vrcp.f32 %v2263_v2 }
 0x84b   : > { %v1766_v43 = vpop.permute.xlu1 %1765 }
 0x84c   : > { %v1772_v46 = vsel %vm1286_vm4, %v4619_v16, %v1766_v43  ;;  %v2266_v16 = vpop.xlane.xlu0 %2265 }
 0x84d   : > { %3636 = vmatmul.mubr.msk.f32.gmra.mrb[22].mxu1 %vm1049_vm2, %v1772_v46  ;;  %4030 = vrcp.f32 %v2266_v16 }
 0x84e   : > { %3659 = vmatprep.mubr.msk.f32.mxu1 %vm4104_vm3, %v4105_v5  ;;  %v4027_v54 = vpop.eup %4026 }
 0x84f   : > { %v2037_v47 = vpop.permute.xlu1 %2036  ;;  %v2270_v55 = vmul.f32 %v4027_v54, %v4664_v32 }
 0x850   : > { %3658 = vmatpush3.msra.mxu1 %v2037_v47 }
 0x851   : > { %3660 = vmatmul.mubr.msk.f32.vlgmr.msra.gmra.mrb[24].mxu1 %vm1385_vm7, %v2029_v14  ;;  %3838 = vmatprep.subr.bf16.mxu1 %v4102_v59  ;;  %v2031_v59 = vmul.f32 %v4025_v50, %v4647_v8 }
 0x852   : > { %3662 = vmatprep.mubr.msk.f32.mxu1 %vm4104_vm3, %v4105_v5  ;;  %v4029_v57 = vpop.eup %4028 }
 0x853   : > { %v3969_v48 = vpop.permute.xlu1 %3968  ;;  %v2271_v58 = vmul.f32 %v4029_v57, %v4672_v34 }
 0x854   : > { %v3971_v51 = vunpack.i.h.bf16 %v3969_v48  ;;  %v3970_v52 = vunpack.i.l.bf16 %v3969_v48 }
 0x855   : > { %3663 = vmatmul.mubr.msk.f32.gmra.mrb[26].mxu1 %vm1385_vm7, %v2030_v49 }
 0x856   : > { %v3839_v53 = vpack.c.bf16 %v3971_v51, %v3970_v52  ;;  %3665 = vmatprep.mubr.msk.f32.mxu1 %vm4104_vm3, %v4105_v5  ;;  %v2487_v52 = vld [vmem:[#allocation2 + $0x20] sm:$0xff] }
 0x857   : > { %v2278_v56 = vpop.permute.xlu1 %2277  ;;  %v4031_v61 = vpop.eup %4030 }
 0x858   : > { %3840 = vmatpush3.bf16.msra.mxu1 %v3839_v53  ;;  %v2272_v62 = vmul.f32 %v4031_v61, %v4666_v33 }
 0x859   : > { %3666 = vmatmul.mubr.msk.f32.gmra.mrb[28].mxu1 %vm1385_vm7, %v2031_v59  ;;  %3687 = vmatprep.subr.mxu1 %v4105_v5 }
 0x85a   : > { %3689 = vmatprep.mubr.msk.f32.mxu1 %vm4104_vm3, %v4105_v5 }
 0x85c   : > { %3688 = vmatpush3.msra.mxu1 %v2278_v56  ;;  %v2488_v56 = vld [vmem:[#allocation2 + $0x28] sm:$0xff] }
 0x85d   : > { %3690 = vmatmul.mubr.msk.f32.vlgmr.msra.gmra.mrb[30].mxu1 %vm1385_vm7, %v2270_v55 }
 0x85e   : > { %3692 = vmatprep.mubr.msk.f32.mxu1 %vm4104_vm3, %v4105_v5 }
 0x861   : > { %3693 = vmatmul.mubr.msk.f32.gmra.mrb[32].mxu1 %vm1385_vm7, %v2271_v58 }
 0x862   : > { %3695 = vmatprep.mubr.msk.f32.mxu1 %vm4104_vm3, %v4105_v5 }
 0x865   : > { %3696 = vmatmul.mubr.msk.f32.gmra.mrb[34].mxu1 %vm1385_vm7, %v2272_v62 }
 0x8e7   : > { %v1859_v0 = vpop.f32.mrb[18].mxu1 }
 0x8e8   : > { %v1860_v26 = vadd.f32 %v4729_v63, %v1859_v0  ;;  %v3631_v6 = vpop.f32.mrb[19].mxu1 }
 0x8ea   : > { %v1883_v8 = vmul.f32 %v4736_v3, %v1860_v26 }
 0x8eb   : > { %v1864_v9 = vpop.f32.mrb[20].mxu1 }
 0x8ec   : > { %v1886_v10 = vadd.f32 %v1883_v8, %v1873_v7  ;;  %v1865_v11 = vadd.f32 %v4729_v63, %v1864_v9  ;;  %v3634_v12 = vpop.f32.mrb[21].mxu1 }
 0x8ee   : > { %1889 = vst.msk [vmem:[#allocation2] sm:$0xff] %vm1049_vm2, %v1886_v10  ;;  %v1884_v15 = vmul.f32 %v4736_v3, %v1865_v11 }
 0x8f0   : > { %v1887_v17 = vadd.f32 %v1884_v15, %v1874_v13 }
 0x8f2   : > { %1890 = vst.msk [vmem:[#allocation2 + $0x8] sm:$0xff] %vm1049_vm2, %v1887_v17 }
 0x8f5   : > { %v4744_v19 = vld [vmem:[#allocation2] sm:$0xff] }
 0x8f6   : > { %v2513_v22 = vsel %vm1049_vm2, %v4744_v19, 0.0 }
 0x8f7   : > { %2514 = vadd.xlane.f32.xlu0 %v2513_v22 }
 0x8f9   : > { %v4758_v41 = vld [vmem:[#allocation2 + $0x8] sm:$0xff] }
 0x8fa   : > { %v2516_v24 = vsel %vm1049_vm2, %v4758_v41, 0.0 }
 0x920   : > { %v1869_v23 = vpop.f32.mrb[22].mxu1 }
 0x921   : > { %v1870_v25 = vadd.f32 %v4729_v63, %v1869_v23  ;;  %v3637_v27 = vpop.f32.mrb[23].mxu1 }
 0x923   : > { %v1885_v29 = vmul.f32 %v4736_v3, %v1870_v25 }
 0x924   : > { %v2116_v21 = vpop.f32.mrb[24].mxu1 }
 0x925   : > { %v1888_v1 = vadd.f32 %v1885_v29, %v1875_v28  ;;  %v3661_v32 = vpop.f32.mrb[25].mxu1  ;;  %v2615_v29 = vld [vmem:[%s4291_s22] sm:$0xff] }
 0x926   : > { %v2617_v32 = vld [vmem:[%s4291_s22 + $0x10] sm:$0xff] }
 0x927   : > { %1891 = vst.msk [vmem:[#allocation2 + $0x10] sm:$0xff] %vm1049_vm2, %v1888_v1 }
 0x928   : > { %v2121_v33 = vpop.f32.mrb[26].mxu1 }
 0x929   : > { %v3664_v4 = vpop.f32.mrb[27].mxu1 }
 0x92c   : > { %v2126_v18 = vpop.f32.mrb[28].mxu1 }
 0x92d   : > { %v3667_v34 = vpop.f32.mrb[29].mxu1 }
 0x92e   : > { %v4751_v60 = vld [vmem:[#allocation2 + $0x10] sm:$0xff] }
 0x92f   : > { %v2519_v20 = vsel %vm1049_vm2, %v4751_v60, 0.0 }
 0x930   : > { %2520 = vadd.xlane.f32.xlu0 %v2519_v20  ;;  %v2357_v35 = vpop.f32.mrb[30].mxu1 }
 0x931   : > { %2374 = vrot.lane.b32.xlu1 %v2357_v35, %s4111_s2  ;;  %v3691_v36 = vpop.f32.mrb[31].mxu1 }
 0x934   : > { %v2362_v37 = vpop.f32.mrb[32].mxu1 }
 0x935   : > { %2376 = vrot.lane.b32.xlu1 %v2362_v37, %s4111_s2  ;;  %v3694_v38 = vpop.f32.mrb[33].mxu1 }
 0x938   : > { %v2367_v39 = vpop.f32.mrb[34].mxu1 }
 0x939   : > { %2378 = vrot.lane.b32.xlu1 %v2367_v39, %s4111_s2  ;;  %v3697_v40 = vpop.f32.mrb[35].mxu1  ;;  %s5027_s2 = sld [smem:[#allocation16_spill]] (!%p3388_p5) }
 0x95d   : > { %2517 = vadd.xlane.f32.xlu1 %v2516_v24 }
 0x984   : > { %v2515_v58 = vpop.xlane.xlu0 %2514 }
 0x985   : > { %v2531_v0 = vmul.f32 0.03125, %v2515_v58 }
 0x9a3   : > { %v2375_v42 = vpop.permute.xlu1 %2374 }
 0x9a4   : > { %v2383_v30 = vsel %vm1286_vm4, %v2116_v21, %v2375_v42  ;;  %v2616_v21 = vld [vmem:[%s4291_s22 + $0x8] sm:$0xff] }
 0x9a5   : > { %3707 = vmatmul.mubr.msk.f32.vlgmr.msra.gmra.mrb[24].mxu0 %vm1049_vm2, %v2383_v30  ;;  %v3847_v1 = vpack.c.bf16 %v2616_v21, %v2615_v29  ;;  %v2803_v21 = vld [vmem:[%s4305_s0 + $0x50] sm:$0xff] }
 0x9a6   : > { %3709 = vmatprep.mubr.msk.f32.mxu0 %vm4104_vm3, %v4105_v5 }
 0x9a7   : > { %v2377_v31 = vpop.permute.xlu1 %2376  ;;  %3848 = vmatprep.subr.bf16.mxu1 %v3847_v1 }
 0x9a8   : > { %v2384_v2 = vsel %vm1286_vm4, %v2121_v33, %v2377_v31  ;;  %3850 = vmatpush3.bf16.msra.mxu1 %v3847_v1  ;;  %v2618_v33 = vld [vmem:[%s4291_s22 + $0x18] sm:$0xff] }
 0x9a9   : > { %3710 = vmatmul.mubr.msk.f32.gmra.mrb[26].mxu0 %vm1049_vm2, %v2384_v2  ;;  %v3851_v4 = vpack.c.bf16 %v2618_v33, %v2617_v32  ;;  %v2804_v1 = vld [vmem:[%s4305_s0 + $0x58] sm:$0xff]  ;;  %v2805_v33 = vld [vmem:[%s4305_s0 + $0x60] sm:$0xff] }
 0x9aa   : > { %3712 = vmatprep.mubr.msk.f32.mxu0 %vm4104_vm3, %v4105_v5  ;;  %v3875_v32 = vpack.c.bf16 %v2804_v1, %v2803_v21 }
 0x9ab   : > { %v2379_v43 = vpop.permute.xlu1 %2378  ;;  %3852 = vmatprep.subr.bf16.mxu1 %v3851_v4 }
 0x9ac   : > { %v2385_v45 = vsel %vm1286_vm4, %v2126_v18, %v2379_v43  ;;  %3854 = vmatpush3.bf16.msra.mxu1 %v3851_v4  ;;  %v2806_v4 = vld [vmem:[%s4305_s0 + $0x68] sm:$0xff] }
 0x9ad   : > { %3713 = vmatmul.mubr.msk.f32.gmra.mrb[28].mxu0 %vm1049_vm2, %v2385_v45 }
 0x9bd   : > { %v2521_v9 = vpop.xlane.xlu0 %2520 }
 0x9be   : > { %v2533_v11 = vmul.f32 0.03125, %v2521_v9  ;;  %v2795_v9 = vld [vmem:[%s4305_s0 + $0x10] sm:$0xff] }
 0x9c0   : > { %v2539_v17 = vsub.f32 %v4751_v60, %v2533_v11  ;;  %v2796_v11 = vld [vmem:[%s4305_s0 + $0x18] sm:$0xff] }
 0x9c2   : > { %v2545_v27 = vmul.f32 %v2539_v17, %v2539_v17 }
 0x9c4   : > { %v2555_v28 = vsel %vm1049_vm2, %v2545_v27, 0.0  ;;  %v2801_v27 = vld [vmem:[%s4305_s0 + $0x40] sm:$0xff] }
 0x9ea   : > { %v2518_v6 = vpop.xlane.xlu1 %2517 }
 0x9eb   : > { %v2532_v8 = vmul.f32 0.03125, %v2518_v6 }
 0x9ed   : > { %v2538_v12 = vsub.f32 %v4758_v41, %v2532_v8  ;;  %v2794_v8 = vld [vmem:[%s4305_s0 + $0x8] sm:$0xff] }
 0x9ef   : > { %v2544_v23 = vmul.f32 %v2538_v12, %v2538_v12 }
 0x9f1   : > { %v2552_v25 = vsel %vm1049_vm2, %v2544_v23, 0.0  ;;  %v2800_v23 = vld [vmem:[%s4305_s0 + $0x38] sm:$0xff] }
 0xa78   : > { %v2472_v46 = vpop.f32.mrb[24].mxu0 }
 0xa79   : > { %v2473_v14 = vadd.f32 %v4729_v63, %v2472_v46  ;;  %v3708_v47 = vpop.f32.mrb[25].mxu0 }
 0xa7b   : > { %v2496_v16 = vmul.f32 %v4736_v3, %v2473_v14 }
 0xa7c   : > { %v2477_v48 = vpop.f32.mrb[26].mxu0 }
 0xa7d   : > { %v2499_v49 = vadd.f32 %v2496_v16, %v2486_v44  ;;  %v2478_v50 = vadd.f32 %v4729_v63, %v2477_v48  ;;  %v3711_v51 = vpop.f32.mrb[27].mxu0 }
 0xa7f   : > { %2502 = vst.msk [vmem:[#allocation2 + $0x18] sm:$0xff] %vm1049_vm2, %v2499_v49  ;;  %v2497_v5 = vmul.f32 %v4736_v3, %v2478_v50 }
 0xa80   : > { %v2482_v53 = vpop.f32.mrb[28].mxu0 }
 0xa81   : > { %v2500_v59 = vadd.f32 %v2497_v5, %v2487_v52  ;;  %v2483_v54 = vadd.f32 %v4729_v63, %v2482_v53  ;;  %v3714_v55 = vpop.f32.mrb[29].mxu0  ;;  %v2537_v63 = vsub.f32 %v4744_v19, %v2531_v0  ;;  %v4826_v52 = vld [vmem:[%s5022_s21] ss:$0 sm:$0xff] }
 0xa82   : > { %v4833_v53 = vld [vmem:[%s877_s5] ss:$0 sm:$0xff] }
 0xa83   : > { %2503 = vst.msk [vmem:[#allocation2 + $0x20] sm:$0xff] %vm1049_vm2, %v2500_v59  ;;  %v2498_v57 = vmul.f32 %v4736_v3, %v2483_v54  ;;  %v2543_v15 = vmul.f32 %v2537_v63, %v2537_v63 }
 0xa85   : > { %v2501_v61 = vadd.f32 %v2498_v57, %v2488_v56  ;;  %v2549_v22 = vsel %vm1049_vm2, %v2543_v15, 0.0  ;;  %v2798_v15 = vld [vmem:[%s4305_s0 + $0x28] sm:$0xff] }
 0xa86   : > { %v4780_v62 = vld [vmem:[#allocation2 + $0x18] sm:$0xff] }
 0xa87   : > { %2504 = vst.msk [vmem:[#allocation2 + $0x28] sm:$0xff] %vm1049_vm2, %v2501_v61  ;;  %v2522_v26 = vsel %vm1049_vm2, %v4780_v62, 0.0 }
 0xa88   : > { %2523 = vadd.xlane.f32.xlu0 %v2522_v26 }
 0xa8a   : > { %v4785_v7 = vld [vmem:[#allocation2 + $0x20] sm:$0xff] }
 0xa8b   : > { %v2525_v3 = vsel %vm1049_vm2, %v4785_v7, 0.0 }
 0xa8c   : > { %2526 = vadd.xlane.f32.xlu0 %v2525_v3 }
 0xa8e   : > { %v4790_v10 = vld [vmem:[#allocation2 + $0x28] sm:$0xff] }
 0xa8f   : > { %v2528_v13 = vsel %vm1049_vm2, %v4790_v10, 0.0 }
 0xa90   : > { %2529 = vadd.xlane.f32.xlu0 %v2528_v13  ;;  %v2797_v13 = vld [vmem:[%s4305_s0 + $0x20] sm:$0xff] }
 0xa94   : > { %2550 = vadd.xlane.f32.xlu0 %v2549_v22  ;;  %v2799_v22 = vld [vmem:[%s4305_s0 + $0x30] sm:$0xff] }
 0xa98   : > { %2553 = vadd.xlane.f32.xlu0 %v2552_v25  ;;  %v3867_v25 = vpack.c.bf16 %v2800_v23, %v2799_v22 }
 0xa9c   : > { %2556 = vadd.xlane.f32.xlu0 %v2555_v28  ;;  %v2802_v28 = vld [vmem:[%s4305_s0 + $0x48] sm:$0xff] }
 0xa9d   : > { %v3871_v29 = vpack.c.bf16 %v2802_v28, %v2801_v27 }
 0xb15   : > { %v2524_v18 = vpop.xlane.xlu0 %2523 }
 0xb16   : > { %v2534_v34 = vmul.f32 0.03125, %v2524_v18  ;;  %v3879_v18 = vpack.c.bf16 %v2806_v4, %v2805_v33 }
 0xb18   : > { %v4804_v20 = vsub.f32 %v4780_v62, %v2534_v34  ;;  %v2807_v34 = vld [vmem:[%s4305_s0 + $0x70] sm:$0xff] }
 0xb19   : > { %v2527_v35 = vpop.xlane.xlu0 %2526 }
 0xb1a   : > { %v2535_v36 = vmul.f32 0.03125, %v2527_v35  ;;  %v2546_v37 = vmul.f32 %v4804_v20, %v4804_v20  ;;  %v2808_v35 = vld [vmem:[%s4305_s0 + $0x78] sm:$0xff] }
 0xb1c   : > { %v4809_v38 = vsub.f32 %v4785_v7, %v2535_v36  ;;  %v2558_v39 = vsel %vm1049_vm2, %v2546_v37, 0.0  ;;  %v3883_v36 = vpack.c.bf16 %v2808_v35, %v2807_v34 }
 0xb1d   : > { %2559 = vadd.xlane.f32.xlu0 %v2558_v39  ;;  %v2530_v40 = vpop.xlane.xlu0 %2529 }
 0xb1e   : > { %v2536_v24 = vmul.f32 0.03125, %v2530_v40  ;;  %v2547_v42 = vmul.f32 %v4809_v38, %v4809_v38 }
 0xb20   : > { %v4815_v30 = vsub.f32 %v4790_v10, %v2536_v24  ;;  %v2561_v31 = vsel %vm1049_vm2, %v2547_v42, 0.0 }
 0xb21   : > { %2562 = vadd.xlane.f32.xlu0 %v2561_v31  ;;  %v2551_v2 = vpop.xlane.xlu0 %2550 }
 0xb22   : > { %v2567_v43 = vmul.f32 0.03125, %v2551_v2  ;;  %v2548_v45 = vmul.f32 %v4815_v30, %v4815_v30 }
 0xb24   : > { %v2573_v46 = vadd.f32 1e-06, %v2567_v43  ;;  %v2564_v14 = vsel %vm1049_vm2, %v2548_v45, 0.0 }
 0xb25   : > { %2565 = vadd.xlane.f32.xlu1 %v2564_v14  ;;  %v2554_v47 = vpop.xlane.xlu0 %2553 }
 0xb26   : > { %4032 = vrsqrt.f32 %v2573_v46  ;;  %v2568_v44 = vmul.f32 0.03125, %v2554_v47 }
 0xb28   : > { %v2574_v16 = vadd.f32 1e-06, %v2568_v44 }
 0xb29   : > { %v2557_v48 = vpop.xlane.xlu0 %2556 }
 0xb2a   : > { %4034 = vrsqrt.f32 %v2574_v16  ;;  %v2569_v49 = vmul.f32 0.03125, %v2557_v48 }
 0xb2c   : > { %v2575_v50 = vadd.f32 1e-06, %v2569_v49 }
 0xb2e   : > { %4036 = vrsqrt.f32 %v2575_v50 }
 0xb30   : > { %v4033_v51 = vpop.eup %4032 }
 0xb31   : > { %v2585_v5 = vmul.f32 %v4033_v51, %v2537_v63  ;;  %v2793_v63 = vld [vmem:[%s4305_s0] sm:$0xff] }
 0xb32   : > { %v3855_v3 = vpack.c.bf16 %v2794_v8, %v2793_v63 }
 0xb33   : > { %v2597_v59 = vmul.f32 %v4826_v52, %v2585_v5 }
 0xb34   : > { %v4035_v54 = vpop.eup %4034  ;;  %3856 = vmatprep.subr.bf16.mxu0 %v3855_v3 }
 0xb35   : > { %v2586_v55 = vmul.f32 %v4035_v54, %v2538_v12  ;;  %v2609_v56 = vadd.f32 %v4833_v53, %v2597_v59  ;;  %3858 = vmatpush3.bf16.msra.mxu0 %v3855_v3  ;;  %v3859_v12 = vpack.c.bf16 %v2796_v11, %v2795_v9 }
 0xb37   : > { %v2598_v57 = vmul.f32 %v4826_v52, %v2586_v55  ;;  %3723 = vmatprep.mubr.msk.f32.mxu1 %vm1049_vm2, %v2609_v56  ;;  %3860 = vmatprep.subr.bf16.mxu0 %v3859_v12 }
 0xb38   : > { %v4037_v58 = vpop.eup %4036 }
 0xb39   : > { %v2610_v61 = vadd.f32 %v4833_v53, %v2598_v57  ;;  %v2587_v0 = vmul.f32 %v4037_v58, %v2539_v17  ;;  %3862 = vmatpush3.bf16.msra.mxu0 %v3859_v12  ;;  %v3863_v17 = vpack.c.bf16 %v2798_v15, %v2797_v13 }
 0xb3b   : > { %3724 = vmatmul.mubr.msk.f32.vlgmr.msra.gmra.mrb[36].mxu1 %vm1049_vm2, %v2610_v61  ;;  %v2599_v26 = vmul.f32 %v4826_v52, %v2587_v0  ;;  %3864 = vmatprep.subr.bf16.mxu0 %v3863_v17 }
 0xb3d   : > { %v2611_v6 = vadd.f32 %v4833_v53, %v2599_v26  ;;  %3866 = vmatpush3.bf16.msra.mxu0 %v3863_v17 }
 0xb3e   : > { %3868 = vmatprep.subr.bf16.mxu0 %v3867_v25 }
 0xb3f   : > { %3726 = vmatprep.mubr.msk.f32.mxu1 %vm1049_vm2, %v2611_v6 }
 0xb41   : > { %3870 = vmatpush3.bf16.msra.mxu0 %v3867_v25 }
 0xb42   : > { %3872 = vmatprep.subr.bf16.mxu0 %v3871_v29 }
 0xb45   : > { %3874 = vmatpush3.bf16.msra.mxu0 %v3871_v29 }
 0xb46   : > { %3876 = vmatprep.subr.bf16.mxu0 %v3875_v32 }
 0xb49   : > { %3878 = vmatpush3.bf16.msra.mxu0 %v3875_v32 }
 0xb4a   : > { %3880 = vmatprep.subr.bf16.mxu0 %v3879_v18 }
 0xb4d   : > { %3882 = vmatpush3.bf16.msra.mxu0 %v3879_v18 }
 0xb4e   : > { %3884 = vmatprep.subr.bf16.mxu0 %v3883_v36 }
 0xb51   : > { %3886 = vmatpush3.bf16.msra.mxu0 %v3883_v36 }
 0xbaa   : > { %v2560_v37 = vpop.xlane.xlu0 %2559 }
 0xbab   : > { %v2570_v39 = vmul.f32 0.03125, %v2560_v37 }
 0xbad   : > { %v2576_v40 = vadd.f32 1e-06, %v2570_v39 }
 0xbae   : > { %v2563_v24 = vpop.xlane.xlu0 %2562 }
 0xbaf   : > { %4038 = vrsqrt.f32 %v2576_v40  ;;  %v2571_v42 = vmul.f32 0.03125, %v2563_v24 }
 0xbb1   : > { %v2577_v31 = vadd.f32 1e-06, %v2571_v42 }
 0xbb2   : > { %v2566_v2 = vpop.xlane.xlu1 %2565 }
 0xbb3   : > { %4040 = vrsqrt.f32 %v2577_v31  ;;  %v2572_v43 = vmul.f32 0.03125, %v2566_v2 }
 0xbb5   : > { %v2578_v45 = vadd.f32 1e-06, %v2572_v43 }
 0xbb7   : > { %4042 = vrsqrt.f32 %v2578_v45 }
 0xbb9   : > { %v4039_v46 = vpop.eup %4038 }
 0xbba   : > { %v2588_v14 = vmul.f32 %v4039_v46, %v4804_v20 }
 0xbbc   : > { %v2600_v47 = vmul.f32 %v4826_v52, %v2588_v14 }
 0xbbd   : > { %v4041_v44 = vpop.eup %4040 }
 0xbbe   : > { %v2612_v16 = vadd.f32 %v4833_v53, %v2600_v47  ;;  %v2589_v48 = vmul.f32 %v4041_v44, %v4809_v38  ;;  %v3379_v38 = vld [vmem:[%s5023_s6] ss:$0 sm:$0xff] }
 0xbc0   : > { %3727 = vmatmul.mubr.msk.f32.gmra.mrb[38].mxu1 %vm1049_vm2, %v2612_v16  ;;  %v2601_v49 = vmul.f32 %v4826_v52, %v2589_v48 }
 0xbc1   : > { %v4043_v50 = vpop.eup %4042 }
 0xbc2   : > { %v2613_v51 = vadd.f32 %v4833_v53, %v2601_v49  ;;  %v2590_v5 = vmul.f32 %v4043_v50, %v4815_v30 }
 0xbc4   : > { %3729 = vmatprep.mubr.msk.f32.mxu1 %vm1049_vm2, %v2613_v51  ;;  %v2602_v20 = vmul.f32 %v4826_v52, %v2590_v5 }
 0xbc6   : > { %v2614_v59 = vadd.f32 %v4833_v53, %v2602_v20 }
 0xbc8   : > { %3730 = vmatmul.mubr.msk.f32.gmra.mrb[40].mxu1 %vm1049_vm2, %v2614_v59 }
 0xc0e   : > { %v3725_v54 = vpop.f32.mrb[36].mxu1 }
 0xc0f   : > { %v2716_v55 = vadd.f32 %v3725_v54, %v3379_v38  ;;  %v2710_v56 = vpop.f32.mrb[37].mxu1 }
 0xc10   : > { %v2711_v57 = vadd.f32 %v3379_v38, %v2710_v56 }
 0xc11   : > { %v2740_v58 = vmul.f32 %v2716_v55, %v2716_v55 }
 0xc12   : > { %v2739_v61 = vmul.f32 %v2711_v57, %v2711_v57 }
 0xc13   : > { %v2746_v30 = vmul.f32 %v2740_v58, %v2716_v55 }
 0xc14   : > { %v2745_v0 = vmul.f32 %v2739_v61, %v2711_v57 }
 0xc15   : > { %v2752_v26 = vmul.f32 0.044715, %v2746_v30 }
 0xc16   : > { %v2751_v6 = vmul.f32 0.044715, %v2745_v0 }
 0xc17   : > { %v2758_v52 = vadd.f32 %v2752_v26, %v2716_v55  ;;  %v3386_v26 = vld [vmem:[%s893_s7] ss:$0 sm:$0xff]  ;;  %s5029_s7 = sld [smem:[#allocation19_spill]] (!%p3388_p5) }
 0xc18   : > { %v2757_v63 = vadd.f32 %v2751_v6, %v2711_v57 }
 0xc19   : > { %v2764_v53 = vmul.f32 0.7978846, %v2758_v52  ;;  %v3387_v52 = vld [vmem:[%s5024_s25] ss:$0 sm:$0xff] }
 0xc1a   : > { %v2763_v8 = vmul.f32 0.7978846, %v2757_v63 }
 0xc1b   : > { %4044 = vtanh.f32 %v2764_v53 }
 0xc1c   : > { %4046 = vtanh.f32 %v2763_v8 }
 0xc25   : > { %v4045_v3 = vpop.eup %4044 }
 0xc26   : > { %v4047_v9 = vpop.eup %4046  ;;  %v2776_v11 = vadd.f32 1.0, %v4045_v3 }
 0xc27   : > { %v2775_v12 = vadd.f32 1.0, %v4047_v9 }
 0xc28   : > { %v2782_v13 = vmul.f32 0.5, %v2776_v11 }
 0xc29   : > { %v2781_v15 = vmul.f32 0.5, %v2775_v12 }
 0xc2a   : > { %v2788_v22 = vmul.f32 %v2782_v13, %v2716_v55 }
 0xc2b   : > { %v2787_v17 = vmul.f32 %v2781_v15, %v2711_v57 }
 0xc2d   : > { %3764 = vmatprep.mubr.f32.mxu0 %v2787_v17 }
 0xc2e   : > { %3765 = vmatmul.mubr.f32.vlgmr.msra.gmra.mrb[30].mxu0 %v2788_v22 }
 0xc93   : > { %v3728_v23 = vpop.f32.mrb[38].mxu1 }
 0xc94   : > { %v2726_v25 = vadd.f32 %v3728_v23, %v3379_v38  ;;  %v2720_v27 = vpop.f32.mrb[39].mxu1 }
 0xc95   : > { %v2721_v28 = vadd.f32 %v3379_v38, %v2720_v27 }
 0xc96   : > { %v2742_v29 = vmul.f32 %v2726_v25, %v2726_v25 }
 0xc97   : > { %v2741_v21 = vmul.f32 %v2721_v28, %v2721_v28 }
 0xc98   : > { %v2748_v1 = vmul.f32 %v2742_v29, %v2726_v25 }
 0xc99   : > { %v2747_v32 = vmul.f32 %v2741_v21, %v2721_v28 }
 0xc9a   : > { %v2754_v33 = vmul.f32 0.044715, %v2748_v1 }
 0xc9b   : > { %v2753_v4 = vmul.f32 0.044715, %v2747_v32  ;;  %v3731_v18 = vpop.f32.mrb[40].mxu1 }
 0xc9c   : > { %v2760_v34 = vadd.f32 %v2754_v33, %v2726_v25  ;;  %v2736_v35 = vadd.f32 %v3731_v18, %v3379_v38  ;;  %v2730_v36 = vpop.f32.mrb[41].mxu1 }
 0xc9d   : > { %v2759_v37 = vadd.f32 %v2753_v4, %v2721_v28  ;;  %v2731_v39 = vadd.f32 %v3379_v38, %v2730_v36 }
 0xc9e   : > { %v2766_v40 = vmul.f32 0.7978846, %v2760_v34  ;;  %v2744_v24 = vmul.f32 %v2736_v35, %v2736_v35 }
 0xc9f   : > { %v2765_v42 = vmul.f32 0.7978846, %v2759_v37  ;;  %v2743_v31 = vmul.f32 %v2731_v39, %v2731_v39 }
 0xca0   : > { %v2750_v2 = vmul.f32 %v2744_v24, %v2736_v35  ;;  %4048 = vtanh.f32 %v2766_v40 }
 0xca1   : > { %v2749_v43 = vmul.f32 %v2743_v31, %v2731_v39  ;;  %4050 = vtanh.f32 %v2765_v42 }
 0xca2   : > { %v2756_v45 = vmul.f32 0.044715, %v2750_v2 }
 0xca3   : > { %v2755_v46 = vmul.f32 0.044715, %v2749_v43 }
 0xca4   : > { %v2762_v14 = vadd.f32 %v2756_v45, %v2736_v35 }
 0xca5   : > { %v2761_v47 = vadd.f32 %v2755_v46, %v2731_v39 }
 0xca6   : > { %v2768_v44 = vmul.f32 0.7978846, %v2762_v14 }
 0xca7   : > { %v2767_v16 = vmul.f32 0.7978846, %v2761_v47 }
 0xca8   : > { %4052 = vtanh.f32 %v2768_v44 }
 0xca9   : > { %4054 = vtanh.f32 %v2767_v16 }
 0xcaa   : > { %v4049_v48 = vpop.eup %4048 }
 0xcab   : > { %v4051_v49 = vpop.eup %4050  ;;  %v2778_v50 = vadd.f32 1.0, %v4049_v48 }
 0xcac   : > { %v2777_v51 = vadd.f32 1.0, %v4051_v49 }
 0xcad   : > { %v2784_v5 = vmul.f32 0.5, %v2778_v50 }
 0xcae   : > { %v2783_v20 = vmul.f32 0.5, %v2777_v51 }
 0xcaf   : > { %v2790_v38 = vmul.f32 %v2784_v5, %v2726_v25 }
 0xcb0   : > { %v2789_v59 = vmul.f32 %v2783_v20, %v2721_v28 }
 0xcb2   : > { %v4053_v54 = vpop.eup %4052  ;;  %3767 = vmatprep.mubr.f32.mxu0 %v2789_v59  ;;  %v3018_v59 = vld [vmem:[%s5025_s4] sm:$0xff] (!%p3388_p5) }
 0xcb3   : > { %v4055_v55 = vpop.eup %4054  ;;  %3768 = vmatmul.mubr.f32.gmra.mrb[32].mxu0 %v2790_v38  ;;  %v2780_v56 = vadd.f32 1.0, %v4053_v54  ;;  %v3019_v38 = vld [vmem:[%s5026_s28 + $0x8] sm:$0xff] (!%p3388_p5)  ;;  %v3020_v54 = vld [vmem:[%s5026_s28 + $0x10] sm:$0xff] (!%p3388_p5) }
 0xcb4   : > { %v2779_v57 = vadd.f32 1.0, %v4055_v55  ;;  %v3887_v55 = vpack.c.bf16 (!%p3388_p5), %v3019_v38, %v3018_v59 }
 0xcb5   : > { %v2786_v58 = vmul.f32 0.5, %v2780_v56  ;;  %v3021_v56 = vld [vmem:[%s5026_s28 + $0x18] sm:$0xff] (!%p3388_p5) }
 0xcb6   : > { %v2785_v61 = vmul.f32 0.5, %v2779_v57  ;;  %v3891_v57 = vpack.c.bf16 (!%p3388_p5), %v3021_v56, %v3020_v54  ;;  %3888 = vmatprep.subr.bf16.mxu0 (!%p3388_p5), %v3887_v55  ;;  %3901 = vmatprep.subr.bf16.mxu1 (!%p3388_p5), %v3887_v55 }
 0xcb7   : > { %v2792_v0 = vmul.f32 %v2786_v58, %v2736_v35  ;;  %3890 = vmatpush3.bf16.msra.mxu0 (!%p3388_p5), %v3887_v55  ;;  %3903 = vmatpush3.bf16.msra.mxu1 (!%p3388_p5), %v3887_v55 }
 0xcb8   : > { %v2791_v30 = vmul.f32 %v2785_v61, %v2731_v39  ;;  %3892 = vmatprep.subr.bf16.mxu0 (!%p3388_p5), %v3891_v57  ;;  %3902 = vmatprep.subr.bf16.mxu1 (!%p3388_p5), %v3891_v57 }
 0xcba   : > { %3770 = vmatprep.mubr.f32.mxu0 %v2791_v30 }
 0xcbb   : > { %3771 = vmatmul.mubr.f32.gmra.mrb[34].mxu0 %v2792_v0  ;;  %3904 = vmatpush3.bf16.msra.mxu1 (!%p3388_p5), %v3891_v57 }
 0xcbc   : > { %3894 = vmatpush3.bf16.msra.mxu0 (!%p3388_p5), %v3891_v57 }
 0xd01   : > { %v3766_v6 = vpop.f32.mrb[30].mxu0 }
 0xd02   : > { %v2888_v63 = vadd.f32 %v3766_v6, %v3386_v26  ;;  %v2882_v53 = vpop.f32.mrb[31].mxu0 }
 0xd03   : > { %v2883_v8 = vadd.f32 %v3386_v26, %v2882_v53 }
 0xd04   : > { %v2919_v3 = vmul.f32 %v3387_v52, %v2888_v63 }
 0xd05   : > { %v2918_v9 = vmul.f32 %v3387_v52, %v2883_v8 }
 0xd06   : > { %v2925_v11 = vadd.f32 %v2919_v3, %v4758_v41 }
 0xd07   : > { %v2924_v12 = vadd.f32 %v2918_v9, %v4744_v19 }
 0xd08   : > { %2931 = vst.msk [vmem:[#allocation2 + $0x8] sm:$0xff] %vm1049_vm2, %v2925_v11 }
 0xd09   : > { %2930 = vst.msk [vmem:[#allocation2] sm:$0xff] %vm1049_vm2, %v2924_v12  ;;  %v3389_v12 = vld [vmem:[%s5027_s2] ss:$0 sm:$0xff] (!%p3388_p5) }
 0xd86   : > { %v3769_v13 = vpop.f32.mrb[32].mxu0 }
 0xd87   : > { %v2898_v15 = vadd.f32 %v3769_v13, %v3386_v26  ;;  %v2892_v17 = vpop.f32.mrb[33].mxu0 }
 0xd88   : > { %v2893_v22 = vadd.f32 %v3386_v26, %v2892_v17 }
 0xd89   : > { %v2921_v23 = vmul.f32 %v3387_v52, %v2898_v15  ;;  %v3390_v15 = vld [vmem:[%s5028_s3] ss:$0 sm:$0xff] (!%p3388_p5) }
 0xd8a   : > { %v2920_v25 = vmul.f32 %v3387_v52, %v2893_v22 }
 0xd8b   : > { %v2927_v27 = vadd.f32 %v2921_v23, %v4780_v62  ;;  %v2941_v62 = vld [vmem:[#allocation2 + $0x8] sm:$0xff] (!%p3388_p5) }
 0xd8c   : > { %v2926_v28 = vadd.f32 %v2920_v25, %v4751_v60  ;;  %v2940_v60 = vld [vmem:[#allocation2] sm:$0xff] (!%p3388_p5)  ;;  %v2949_v35 = vsel (!%p3388_p5), %vm1049_vm2, %v2941_v62, 0.0 }
 0xd8d   : > { %2933 = vst.msk [vmem:[#allocation2 + $0x18] sm:$0xff] %vm1049_vm2, %v2927_v27  ;;  %v2946_v34 = vsel (!%p3388_p5), %vm1049_vm2, %v2940_v60, 0.0  ;;  %2950 = vadd.xlane.f32.xlu1 (!%p3388_p5), %v2949_v35 }
 0xd8e   : > { %2932 = vst.msk [vmem:[#allocation2 + $0x10] sm:$0xff] %vm1049_vm2, %v2926_v28  ;;  %v3772_v41 = vpop.f32.mrb[34].mxu0  ;;  %2947 = vadd.xlane.f32.xlu0 (!%p3388_p5), %v2946_v34 }
 0xd8f   : > { %v2908_v19 = vadd.f32 %v3772_v41, %v3386_v26  ;;  %v2902_v29 = vpop.f32.mrb[35].mxu0 }
 0xd90   : > { %v2903_v21 = vadd.f32 %v3386_v26, %v2902_v29  ;;  %2939 = sbr.rel (%p3388_p5) target bundleno = 4015 (0xfaf), region = 120 }
 0xd91   : > { %v2923_v1 = vmul.f32 %v3387_v52, %v2908_v19 }
 0xd92   : > { %v2922_v32 = vmul.f32 %v3387_v52, %v2903_v21 }
 0xd93   : > { %v2929_v33 = vadd.f32 %v2923_v1, %v4790_v10 }
 0xd94   : > { %v2928_v4 = vadd.f32 %v2922_v32, %v4785_v7  ;;  %v2942_v18 = vld [vmem:[#allocation2 + $0x18] sm:$0xff] (!%p3388_p5) }
 0xd95   : > { %2935 = vst.msk [vmem:[#allocation2 + $0x28] sm:$0xff] %vm1049_vm2, %v2929_v33  ;;  %v2952_v10 = vsel (!%p3388_p5), %vm1049_vm2, %v2942_v18, 0.0 }
 0xd96   : > { %2934 = vst.msk [vmem:[#allocation2 + $0x20] sm:$0xff] %vm1049_vm2, %v2928_v4  ;;  %2953 = vadd.xlane.f32.xlu0 (!%p3388_p5), %v2952_v10 }
 0xd9d   : > { %v2943_v36 = vld [vmem:[#allocation2 + $0x20] sm:$0xff] }
 0xd9e   : > { %v2955_v7 = vsel %vm1049_vm2, %v2943_v36, 0.0 }
 0xd9f   : > { %2956 = vadd.xlane.f32.xlu1 %v2955_v7 }
 0xe1a   : > { %v2951_v39 = vpop.xlane.xlu1 %2950 }
 0xe1b   : > { %v2948_v37 = vpop.xlane.xlu0 %2947  ;;  %v2959_v24 = vmul.f32 0.03125, %v2951_v39 }
 0xe1c   : > { %v2958_v40 = vmul.f32 0.03125, %v2948_v37 }
 0xe1d   : > { %v2963_v31 = vsub.f32 %v2941_v62, %v2959_v24 }
 0xe1e   : > { %v2962_v42 = vsub.f32 %v2940_v60, %v2958_v40  ;;  %v3391_v60 = vld [vmem:[%s5029_s7] ss:$0 sm:$0xff] }
 0xe1f   : > { %v2967_v47 = vmul.f32 %v2963_v31, %v2963_v31 }
 0xe20   : > { %v2966_v14 = vmul.f32 %v2962_v42, %v2962_v42 }
 0xe21   : > { %v2973_v49 = vsel %vm1049_vm2, %v2967_v47, 0.0 }
 0xe22   : > { %v2970_v48 = vsel %vm1049_vm2, %v2966_v14, 0.0 }
 0xe23   : > { %v2954_v2 = vpop.xlane.xlu0 %2953  ;;  %2971 = vadd.xlane.f32.xlu0 %v2970_v48 }
 0xe24   : > { %v2960_v45 = vmul.f32 0.03125, %v2954_v2 }
 0xe26   : > { %v2964_v44 = vsub.f32 %v2942_v18, %v2960_v45 }
 0xe27   : > { %2974 = vadd.xlane.f32.xlu0 %v2973_v49 }
 0xe28   : > { %v2968_v50 = vmul.f32 %v2964_v44, %v2964_v44 }
 0xe2a   : > { %v2976_v5 = vsel %vm1049_vm2, %v2968_v50, 0.0 }
 0xe2b   : > { %2977 = vadd.xlane.f32.xlu1 %v2976_v5 }
 0xe2c   : > { %v2957_v43 = vpop.xlane.xlu1 %2956 }
 0xe2d   : > { %v2961_v46 = vmul.f32 0.03125, %v2957_v43 }
 0xe2f   : > { %v2965_v16 = vsub.f32 %v2943_v36, %v2961_v46 }
 0xe31   : > { %v2969_v51 = vmul.f32 %v2965_v16, %v2965_v16 }
 0xe33   : > { %v2979_v20 = vsel %vm1049_vm2, %v2969_v51, 0.0 }
 0xe34   : > { %2980 = vadd.xlane.f32.xlu1 %v2979_v20 }
 0xeb0   : > { %v2972_v58 = vpop.xlane.xlu0 %2971 }
 0xeb1   : > { %v2982_v61 = vmul.f32 0.03125, %v2972_v58 }
 0xeb3   : > { %v2986_v30 = vadd.f32 1e-06, %v2982_v61 }
 0xeb4   : > { %v2975_v26 = vpop.xlane.xlu0 %2974 }
 0xeb5   : > { %4056 = vrsqrt.f32 %v2986_v30  ;;  %v2983_v52 = vmul.f32 0.03125, %v2975_v26 }
 0xeb7   : > { %v2987_v53 = vadd.f32 1e-06, %v2983_v52 }
 0xeb8   : > { %v2978_v0 = vpop.xlane.xlu1 %2977 }
 0xeb9   : > { %v2984_v6 = vmul.f32 0.03125, %v2978_v0 }
 0xebb   : > { %v2988_v63 = vadd.f32 1e-06, %v2984_v6 }
 0xebd   : > { %4058 = vrsqrt.f32 %v2988_v63 }
 0xebe   : > { %4060 = vrsqrt.f32 %v2987_v53 }
 0xebf   : > { %v4057_v11 = vpop.eup %4056 }
 0xec0   : > { %v2994_v13 = vmul.f32 %v4057_v11, %v2962_v42 }
 0xec1   : > { %v2981_v8 = vpop.xlane.xlu1 %2980 }
 0xec2   : > { %v2985_v3 = vmul.f32 0.03125, %v2981_v8  ;;  %v3004_v17 = vmul.f32 %v3389_v12, %v2994_v13 }
 0xec4   : > { %v2989_v9 = vadd.f32 1e-06, %v2985_v3  ;;  %v3014_v25 = vadd.f32 %v3390_v15, %v3004_v17 }
 0xec6   : > { %4062 = vrsqrt.f32 %v2989_v9  ;;  %3781 = vmatprep.mubr.msk.f32.mxu0 %vm1049_vm2, %v3014_v25 }
 0xec7   : > { %v4059_v22 = vpop.eup %4058 }
 0xec8   : > { %v4061_v23 = vpop.eup %4060  ;;  %v2996_v27 = vmul.f32 %v4059_v22, %v2964_v44 }
 0xec9   : > { %v2995_v28 = vmul.f32 %v4061_v23, %v2963_v31 }
 0xeca   : > { %v3006_v41 = vmul.f32 %v3389_v12, %v2996_v27 }
 0xecb   : > { %v3005_v29 = vmul.f32 %v3389_v12, %v2995_v28 }
 0xecc   : > { %v3016_v21 = vadd.f32 %v3390_v15, %v3006_v41 }
 0xecd   : > { %v3015_v32 = vadd.f32 %v3390_v15, %v3005_v29 }
 0xece   : > { %3784 = vmatprep.mubr.msk.f32.mxu1 %vm1049_vm2, %v3016_v21 }
 0xecf   : > { %3782 = vmatmul.mubr.msk.f32.vlgmr.msra.gmra.mrb[0].mxu0 %vm1049_vm2, %v3015_v32 }
 0xed0   : > { %v4063_v19 = vpop.eup %4062 }
 0xed1   : > { %v2997_v1 = vmul.f32 %v4063_v19, %v2965_v16 }
 0xed3   : > { %v3007_v33 = vmul.f32 %v3389_v12, %v2997_v1 }
 0xed5   : > { %v3017_v4 = vadd.f32 %v3390_v15, %v3007_v33 }
 0xed7   : > { %3785 = vmatmul.mubr.msk.f32.vlgmr.msra.gmra.mrb[0].mxu1 %vm1049_vm2, %v3017_v4 }
 0xfa2   : > { %v3783_v62 = vpop.f32.mrb[0].mxu0 }
 0xfa3   : > { %v3113_v18 = vadd.f32 %v3783_v62, %v3391_v60  ;;  %v3107_v34 = vpop.f32.mrb[1].mxu0 }
 0xfa4   : > { %v3108_v35 = vadd.f32 %v3391_v60, %v3107_v34 }
 0xfa5   : > { %3127 = vst [vmem:[#allocation3 + $0x8] sm:$0xff] %v3113_v18 }
 0xfa6   : > { %3126 = vst [vmem:[#allocation3] sm:$0xff] %v3108_v35 }
 0xfaa   : > { %v3786_v36 = vpop.f32.mrb[0].mxu1 }
 0xfab   : > { %v3123_v10 = vadd.f32 %v3786_v36, %v3391_v60  ;;  %v3117_v7 = vpop.f32.mrb[1].mxu1 }
 0xfac   : > { %v3118_v37 = vadd.f32 %v3391_v60, %v3117_v7 }
 0xfad   : > { %3129 = vst [vmem:[#allocation3 + $0x18] sm:$0xff] %v3123_v10 }
 0xfae   : > { %3128 = vst [vmem:[#allocation3 + $0x10] sm:$0xff] %v3118_v37 }
 0xfaf PF: > { %p3909_p6 = scmp.eq.s32.totalorder %s4241_s30, 1  ;;  %s4112_s4 = smov [#allocation3]  }
 0xfb0   : > { %s3136_s22 = sshll.u32 %s4112_s4, 4  ;;  %s3137_s22 = int_to_ptr.vmem [resolvable:$true] %s3136_s22 }
 0xfb1   : > { %s4064_s23 = scalar_lea.vmem %s3137_s22, 512  ;;  %p4071_p10 = scmp.lt.s32.totalorder %s3137_s22, %s3137_s22 }
 0xfb2   : > { %p4065_p7 = scmp.ne.s32.totalorder %s3137_s22, %s4064_s23  ;;  %p4072_p11 = scmp.lt.s32.totalorder %s4064_s23, %s4064_s23 }
 0xfb4   : > { %p4066_p8 = pnand %p4065_p7, %p3909_p6  ;;  %p4073_p12 = por %p4072_p11, %p4071_p10 }
 0xfb6   : > { %p4067_p9 = pneg %p4066_p8 }
 0xfb8   : > { %p4074_p13 = pnand %p4073_p12, %p4067_p9 }
 0xfba   : > { %4077 = shalt.err (!%p4074_p13)
}
 0xfbb   : > { %s5030_s9 = sld [smem:[#allocation20_spill]] }
 0xfc1   : > { %s4078_s0 = scalar_lea.hbm %s5030_s9, 512 }
 0xfc2   : > { %p4079_p0 = scmp.ne.s32.totalorder %s5030_s9, %s4078_s0  ;;  %p4084_p3 = scmp.lt.u32.totalorder %s4078_s0, %s5030_s9 }
 0xfc4   : > { %p4080_p1 = pnand %p4079_p0, %p3909_p6 }
 0xfc6   : > { %p4081_p2 = pneg %p4080_p1 }
 0xfc8   : > { %p4086_p4 = pnand %p4084_p3, %p4081_p2 }
 0xfca   : > { %4089 = shalt.err (!%p4086_p4)
}
 0xfcb   : > { %s4113_s29 = smov 128   ;;  %s4114_s3 = smov 8  }
 0xfcc   : > { %3906 = dma.vmem_to_hbm [thread:$0]  (%p3909_p6), %s3137_s22, 512, %s5030_s9, [#allocation4], %s4113_s29, %s4113_s29, %s4114_s3  }
 0xfcd   : > { %4095 = dma.done.wait (%p3909_p6), [#allocation4], 512  }
 0xfce   : > { %4097 = vsyncadd (%p3909_p6), [#allocation4], 4294966784 }
 0xfcf PF: > { %s5031_s7 = sld [smem:[#allocation6_spill]] }
 0xfd5   : > { %s34_s4 = sadd.s32 1, %s5031_s7  }
 0xfd6   : > { %p31_p5 = scmp.ge.s32.totalorder %s34_s4, 4  }
 0xfd8   :  { %33 = sbr.rel (!%p31_p5) target bundleno = 16 (0x10), region = 186 }
 0xfdf   :  { %3152 = vsyncpa [#allocation4], 1 }
 0xfe0   :  { %3154 = vsyncpa [#allocation4 + $0x1], 1 }

</bundles_post_ra>
